<compile_context>
chip_gen: v6e
topology: v6e:2x2x1
jax: 0.10.0
libtpu: 0.0.40
codegen_flags: <defaults>
</compile_context>

<pallas_src>
import jax
import jax.numpy as jnp
from jax.experimental import pallas as pl
from jax.experimental.pallas import tpu as pltpu

IN_FEATURES = 3 * 28 * 28   # 2352
H1, H2, FEAT = 100, 100, 16
PAD = 128                   # lane-padded feature width
TB_MAX = 1024               # max batch tile (rows), multiple of 8

_SINGLE_BUFFER_OK = True    # flipped to False if pl.Buffered(1) is rejected


def _round_up(n, m):
    return ((n + m - 1) // m) * m


def _cdiv(a, b):
    return (a + b - 1) // b


def _mlp_kernel(x_ref,
                w1_ref, b1_ref,
                w2_ref, b2_ref,
                w3_ref, b3_ref,
                w4_ref, b4_ref,
                out_ref):
    # x tile: (TB, 2352) in source dtype.  1/255 scaling is folded into w1,
    # and the bf16 cast happens here (VALU slack; MXU/DMA are the binding
    # resources), not in the wrapper.
    x = x_ref[...]
    if jnp.issubdtype(x.dtype, jnp.integer):     # uint8 pixels are exact in f32/bf16
        x = x.astype(jnp.float32)
    x = x.astype(jnp.bfloat16)

    # feature: Linear -> ReLU -> Linear -> ReLU -> Linear -> ReLU
    h = jnp.dot(x, w1_ref[...], preferred_element_type=jnp.float32) + b1_ref[...]
    h = jnp.maximum(h, 0.0).astype(jnp.bfloat16)

    h = jnp.dot(h, w2_ref[...], preferred_element_type=jnp.float32) + b2_ref[...]
    h = jnp.maximum(h, 0.0).astype(jnp.bfloat16)

    feat = jnp.dot(h, w3_ref[...], preferred_element_type=jnp.float32) + b3_ref[...]
    feat = jnp.maximum(feat, 0.0)                # (TB, 128) f32, real values in lanes [0:16)

    # classifier
    logits = jnp.dot(feat.astype(jnp.bfloat16), w4_ref[...],
                     preferred_element_type=jnp.float32) + b4_ref[...]

    # Pack into one lane-dense 128-wide slab:
    #   logits lanes [num_classes:128) are exactly 0 (zero-padded W4/b4),
    #   feat   lanes [16:128)          are exactly 0 (zero-padded W3/b3),
    # so rolling feat to lanes [112:128) and adding gives [logits | ... | feat]
    # with a single unmasked 128-lane store (roll is a free XLU op).
    out_ref[...] = logits + pltpu.roll(feat, shift=PAD - FEAT, axis=1)


def mlp_forward(x, prepared_params, num_classes=10, mode=None, return_feat=False):
    """x: (B, 3, 28, 28), float (pixel values 0..255) or uint8.

    prepared_params: output of prepare_params() (bf16 weights, lane-padded,
    1/255 folded into W1).  Returns logits / (feat, logits) / (logits, feat)
    exactly like the torch module."""
    assert num_classes <= PAD - FEAT, "packed output layout needs num_classes <= 112"
    B = x.shape[0]
    x_flat = x.reshape(B, -1)                    # free view; dtype untouched
    assert x_flat.shape[1] == IN_FEATURES

    # Batch tiling: even split of B into TB-row blocks (TB multiple of 8,
    # capped at TB_MAX).  Keep >=2-4 grid steps when B is large enough so
    # input double-buffering and v7x megacore have work; no batch padding.
    n_steps = max(_cdiv(B, TB_MAX), min(4, _cdiv(B, 512)))
    TB = _round_up(_cdiv(B, n_steps), 8)
    grid = _cdiv(B, TB)

    (w1, b1), (w2, b2), (w3, b3), (w4, b4) = prepared_params
    flat_params = (w1, b1, w2, b2, w3, b3, w4, b4)

    def call(single_buffer_weights):
        def resident(shape):
            # Weights/biases: same block every grid step -> VMEM-resident.
            if single_buffer_weights:
                return pl.BlockSpec(shape, lambda i: (0, 0),
                                    pipeline_mode=pl.Buffered(1))
            return pl.BlockSpec(shape, lambda i: (0, 0))

        return pl.pallas_call(
            _mlp_kernel,
            out_shape=jax.ShapeDtypeStruct((B, PAD), jnp.float32),
            grid=(grid,),
            in_specs=[pl.BlockSpec((TB, IN_FEATURES), lambda i: (i, 0))]
                     + [resident(p.shape) for p in flat_params],
            out_specs=pl.BlockSpec((TB, PAD), lambda i: (i, 0)),
            compiler_params=pltpu.CompilerParams(
                dimension_semantics=("parallel",),
                vmem_limit_bytes=48 * 1024 * 1024),
        )(x_flat, *flat_params)

    global _SINGLE_BUFFER_OK
    if _SINGLE_BUFFER_OK:
        try:
            out = call(True)
        except Exception:
            # Older Pallas without pipeline_mode / Buffered(1): fall back to
            # default double-buffered resident weights (slightly more VMEM).
            _SINGLE_BUFFER_OK = False
            out = call(False)
    else:
        out = call(False)

    logits = out[:, :num_classes]
    feat = out[:, PAD - FEAT:]
    if mode == 'tsne' or mode == 'mixup':
        return feat, logits
    if return_feat:
        return logits, feat
    return logits


def init_params(key, num_classes=10):
    """Deterministic init mirroring the torch module's layer shapes.
    Weights stored transposed as (in_features, out_features), f32, unpadded."""
    dims = [(IN_FEATURES, H1), (H1, H2), (H2, FEAT), (FEAT, num_classes)]
    params = []
    for fan_in, fan_out in dims:
        kw, kb, key = jax.random.split(key, 3)
        bound = 1.0 / jnp.sqrt(fan_in)
        w = jax.random.uniform(kw, (fan_in, fan_out), jnp.float32, -bound, bound)
        b = jax.random.uniform(kb, (1, fan_out), jnp.float32, -bound, bound)
        params.append((w, b))
    return params


def prepare_params(params):
    """One-time transform: fold 1/255 into W1 (before the bf16 cast, so the
    scaled weights are what gets quantized), zero-pad every feature dim to
    128 lanes, cast weights to bf16 (biases stay f32)."""
    (w1, b1), (w2, b2), (w3, b3), (w4, b4) = params

    def pad2(a, rows, cols):
        r, c = a.shape
        return jnp.pad(a, ((0, rows - r), (0, cols - c)))

    out = []
    w1 = w1 * (1.0 / 255.0)
    for w, b, rows in ((w1, b1, IN_FEATURES), (w2, b2, PAD),
                       (w3, b3, PAD), (w4, b4, PAD)):
        wp = pad2(w, rows, PAD).astype(jnp.bfloat16)
        bp = pad2(b, 1, PAD).astype(jnp.float32)
        out.append((wp, bp))
    return tuple(out)


def _reference(x, prepared_params, num_classes):
    """Pure-JAX reference mirroring the kernel's bf16 quantization."""
    B = x.shape[0]
    h = x.reshape(B, -1).astype(jnp.bfloat16).astype(jnp.float32)
    (w1, b1), (w2, b2), (w3, b3), (w4, b4) = prepared_params
    h = jnp.maximum(h @ w1.astype(jnp.float32) + b1, 0.0)
    h = h.astype(jnp.bfloat16).astype(jnp.float32)
    h = jnp.maximum(h @ w2.astype(jnp.float32) + b2, 0.0)
    h = h.astype(jnp.bfloat16).astype(jnp.float32)
    feat = jnp.maximum(h @ w3.astype(jnp.float32) + b3, 0.0)
    logits = feat.astype(jnp.bfloat16).astype(jnp.float32) @ w4.astype(jnp.float32) + b4
    return logits[:, :num_classes], feat[:, :FEAT]


if __name__ == "__main__":
    key = jax.random.PRNGKey(0)
    k_x, k_x2, k_p = jax.random.split(key, 3)

    num_classes = 10
    # Small batch; flattened feature dim must be 3*28*28 per the module.
    x = jax.random.uniform(k_x, (2, 3, 28, 28), jnp.float32, 0.0, 255.0)
    raw_params = init_params(k_p, num_classes=num_classes)
    params = prepare_params(raw_params)

    # return_feat path: (logits, feat)
    logits, feat = mlp_forward(x, params, num_classes=num_classes, return_feat=True)
    logits = jax.block_until_ready(logits)
    feat = jax.block_until_ready(feat)

    # tsne/mixup path: (feat, logits)
    feat_t, logits_t = mlp_forward(x, params, num_classes=num_classes, mode='tsne')
    logits_t = jax.block_until_ready(logits_t)

    # logits-only path on a ragged batch (B not a multiple of the tile)
    x2 = jax.random.uniform(k_x2, (20, 3, 28, 28), jnp.float32, 0.0, 255.0)
    logits2 = jax.block_until_ready(mlp_forward(x2, params, num_classes=num_classes))

    ref_logits, ref_feat = _reference(x, params, num_classes)
    ref_logits2, _ = _reference(x2, params, num_classes)

    assert logits.shape == (2, num_classes) and feat.shape == (2, FEAT)
    assert logits_t.shape == (2, num_classes) and feat_t.shape == (2, FEAT)
    assert logits2.shape == (20, num_classes)
    assert jnp.allclose(logits, ref_logits, atol=5e-2, rtol=5e-2)
    assert jnp.allclose(feat, ref_feat, atol=5e-2, rtol=5e-2)
    assert jnp.allclose(logits_t, ref_logits, atol=5e-2, rtol=5e-2)
    assert jnp.allclose(feat_t, ref_feat, atol=5e-2, rtol=5e-2)
    assert jnp.allclose(logits2, ref_logits2, atol=5e-2, rtol=5e-2)

    print("KERNEL_OK")
</pallas_src>

<mosaic_0001>
module attributes {stable_mosaic.version = 11 : i64} {
  func.func @_mlp_kernel(%arg0: i32, %arg1: memref<8x2352xf32, #tpu.memory_space<vmem>>, %arg2: memref<2352x128xbf16, #tpu.memory_space<vmem>>, %arg3: memref<1x128xf32, #tpu.memory_space<vmem>>, %arg4: memref<128x128xbf16, #tpu.memory_space<vmem>>, %arg5: memref<1x128xf32, #tpu.memory_space<vmem>>, %arg6: memref<128x128xbf16, #tpu.memory_space<vmem>>, %arg7: memref<1x128xf32, #tpu.memory_space<vmem>>, %arg8: memref<128x128xbf16, #tpu.memory_space<vmem>>, %arg9: memref<1x128xf32, #tpu.memory_space<vmem>>, %arg10: memref<8x128xf32, #tpu.memory_space<vmem>>) attributes {dimension_semantics = [#tpu.dimension_semantics<parallel>], iteration_bounds = array<i64: 1>, scalar_prefetch = 0 : i64, scratch_operands = 0 : i64, tpu.core_type = #tpu.core_type<tc>, window_params = [{transform_indices = @transform_0, window_bounds = array<i64: 8, 2352>}, {pipeline_mode = #tpu.pipeline_mode<synchronous>, transform_indices = @transform_1, window_bounds = array<i64: 2352, 128>}, {pipeline_mode = #tpu.pipeline_mode<synchronous>, transform_indices = @transform_2, window_bounds = array<i64: 1, 128>}, {pipeline_mode = #tpu.pipeline_mode<synchronous>, transform_indices = @transform_3, window_bounds = array<i64: 128, 128>}, {pipeline_mode = #tpu.pipeline_mode<synchronous>, transform_indices = @transform_4, window_bounds = array<i64: 1, 128>}, {pipeline_mode = #tpu.pipeline_mode<synchronous>, transform_indices = @transform_5, window_bounds = array<i64: 128, 128>}, {pipeline_mode = #tpu.pipeline_mode<synchronous>, transform_indices = @transform_6, window_bounds = array<i64: 1, 128>}, {pipeline_mode = #tpu.pipeline_mode<synchronous>, transform_indices = @transform_7, window_bounds = array<i64: 128, 128>}, {pipeline_mode = #tpu.pipeline_mode<synchronous>, transform_indices = @transform_8, window_bounds = array<i64: 1, 128>}, {transform_indices = @transform_9, window_bounds = array<i64: 8, 128>}]} {
    %c0 = arith.constant 0 : index
    %c0_0 = arith.constant 0 : index
    %0 = vector.load %arg1[%c0, %c0_0] : memref<8x2352xf32, #tpu.memory_space<vmem>>, vector<8x2352xf32>
    %1 = arith.truncf %0 : vector<8x2352xf32> to vector<8x2352xbf16>
    %c0_1 = arith.constant 0 : index
    %c0_2 = arith.constant 0 : index
    %2 = vector.load %arg2[%c0_1, %c0_2] : memref<2352x128xbf16, #tpu.memory_space<vmem>>, vector<2352x128xbf16>
    %cst = arith.constant dense<0.000000e+00> : vector<8x128xf32>
    %3 = tpu.matmul %1, %2, %cst {dimension_numbers = #tpu.dot_dimension_numbers<[1], [0], [0], [1], [0, 0, 1, 1], [], []>} : vector<8x2352xbf16>, vector<2352x128xbf16>, vector<8x128xf32> -> vector<8x128xf32>
    %c0_3 = arith.constant 0 : index
    %c0_4 = arith.constant 0 : index
    %4 = vector.load %arg3[%c0_3, %c0_4] : memref<1x128xf32, #tpu.memory_space<vmem>>, vector<1x128xf32>
    %5 = vector.broadcast %4 : vector<1x128xf32> to vector<8x128xf32>
    %6 = arith.addf %3, %5 : vector<8x128xf32>
    %cst_5 = arith.constant 0.000000e+00 : f32
    %7 = vector.broadcast %cst_5 : f32 to vector<8x128xf32>
    %8 = arith.maximumf %6, %7 : vector<8x128xf32>
    %9 = arith.truncf %8 : vector<8x128xf32> to vector<8x128xbf16>
    %c0_6 = arith.constant 0 : index
    %c0_7 = arith.constant 0 : index
    %10 = vector.load %arg4[%c0_6, %c0_7] : memref<128x128xbf16, #tpu.memory_space<vmem>>, vector<128x128xbf16>
    %cst_8 = arith.constant dense<0.000000e+00> : vector<8x128xf32>
    %11 = tpu.matmul %9, %10, %cst_8 {dimension_numbers = #tpu.dot_dimension_numbers<[1], [0], [0], [1], [0, 0, 1, 1], [], []>} : vector<8x128xbf16>, vector<128x128xbf16>, vector<8x128xf32> -> vector<8x128xf32>
    %c0_9 = arith.constant 0 : index
    %c0_10 = arith.constant 0 : index
    %12 = vector.load %arg5[%c0_9, %c0_10] : memref<1x128xf32, #tpu.memory_space<vmem>>, vector<1x128xf32>
    %13 = vector.broadcast %12 : vector<1x128xf32> to vector<8x128xf32>
    %14 = arith.addf %11, %13 : vector<8x128xf32>
    %cst_11 = arith.constant 0.000000e+00 : f32
    %15 = vector.broadcast %cst_11 : f32 to vector<8x128xf32>
    %16 = arith.maximumf %14, %15 : vector<8x128xf32>
    %17 = arith.truncf %16 : vector<8x128xf32> to vector<8x128xbf16>
    %c0_12 = arith.constant 0 : index
    %c0_13 = arith.constant 0 : index
    %18 = vector.load %arg6[%c0_12, %c0_13] : memref<128x128xbf16, #tpu.memory_space<vmem>>, vector<128x128xbf16>
    %cst_14 = arith.constant dense<0.000000e+00> : vector<8x128xf32>
    %19 = tpu.matmul %17, %18, %cst_14 {dimension_numbers = #tpu.dot_dimension_numbers<[1], [0], [0], [1], [0, 0, 1, 1], [], []>} : vector<8x128xbf16>, vector<128x128xbf16>, vector<8x128xf32> -> vector<8x128xf32>
    %c0_15 = arith.constant 0 : index
    %c0_16 = arith.constant 0 : index
    %20 = vector.load %arg7[%c0_15, %c0_16] : memref<1x128xf32, #tpu.memory_space<vmem>>, vector<1x128xf32>
    %21 = vector.broadcast %20 : vector<1x128xf32> to vector<8x128xf32>
    %22 = arith.addf %19, %21 : vector<8x128xf32>
    %cst_17 = arith.constant 0.000000e+00 : f32
    %23 = vector.broadcast %cst_17 : f32 to vector<8x128xf32>
    %24 = arith.maximumf %22, %23 : vector<8x128xf32>
    %25 = arith.truncf %24 : vector<8x128xf32> to vector<8x128xbf16>
    %c0_18 = arith.constant 0 : index
    %c0_19 = arith.constant 0 : index
    %26 = vector.load %arg8[%c0_18, %c0_19] : memref<128x128xbf16, #tpu.memory_space<vmem>>, vector<128x128xbf16>
    %cst_20 = arith.constant dense<0.000000e+00> : vector<8x128xf32>
    %27 = tpu.matmul %25, %26, %cst_20 {dimension_numbers = #tpu.dot_dimension_numbers<[1], [0], [0], [1], [0, 0, 1, 1], [], []>} : vector<8x128xbf16>, vector<128x128xbf16>, vector<8x128xf32> -> vector<8x128xf32>
    %c0_21 = arith.constant 0 : index
    %c0_22 = arith.constant 0 : index
    %28 = vector.load %arg9[%c0_21, %c0_22] : memref<1x128xf32, #tpu.memory_space<vmem>>, vector<1x128xf32>
    %29 = vector.broadcast %28 : vector<1x128xf32> to vector<8x128xf32>
    %30 = arith.addf %27, %29 : vector<8x128xf32>
    %c112_i32 = arith.constant 112 : i32
    %31 = tpu.dynamic_rotate %24 by %c112_i32 dim 1 : vector<8x128xf32>, i32 -> vector<8x128xf32>
    %32 = arith.addf %30, %31 : vector<8x128xf32>
    %c0_23 = arith.constant 0 : index
    %c0_24 = arith.constant 0 : index
    %33 = vector.load %arg10[%c0_23, %c0_24] : memref<8x128xf32, #tpu.memory_space<vmem>>, vector<8x128xf32>
    tpu.vector_store %arg10[%c0_23, %c0_24], %32 {strides = array<i32>} : memref<8x128xf32, #tpu.memory_space<vmem>>, vector<8x128xf32>,
    return
  }
  func.func @transform_0(%arg0: i32) -> (i32, i32) {
    %c0_i32 = arith.constant 0 : i32
    %c0_i32_0 = arith.constant 0 : i32
    return %arg0, %c0_i32 : i32, i32
  }
  func.func @transform_1(%arg0: i32) -> (i32, i32) {
    %c0_i32 = arith.constant 0 : i32
    %c0_i32_0 = arith.constant 0 : i32
    %c0_i32_1 = arith.constant 0 : i32
    return %c0_i32, %c0_i32_0 : i32, i32
  }
  func.func @transform_2(%arg0: i32) -> (i32, i32) {
    %c0_i32 = arith.constant 0 : i32
    %c0_i32_0 = arith.constant 0 : i32
    %c0_i32_1 = arith.constant 0 : i32
    return %c0_i32, %c0_i32_0 : i32, i32
  }
  func.func @transform_3(%arg0: i32) -> (i32, i32) {
    %c0_i32 = arith.constant 0 : i32
    %c0_i32_0 = arith.constant 0 : i32
    %c0_i32_1 = arith.constant 0 : i32
    return %c0_i32, %c0_i32_0 : i32, i32
  }
  func.func @transform_4(%arg0: i32) -> (i32, i32) {
    %c0_i32 = arith.constant 0 : i32
    %c0_i32_0 = arith.constant 0 : i32
    %c0_i32_1 = arith.constant 0 : i32
    return %c0_i32, %c0_i32_0 : i32, i32
  }
  func.func @transform_5(%arg0: i32) -> (i32, i32) {
    %c0_i32 = arith.constant 0 : i32
    %c0_i32_0 = arith.constant 0 : i32
    %c0_i32_1 = arith.constant 0 : i32
    return %c0_i32, %c0_i32_0 : i32, i32
  }
  func.func @transform_6(%arg0: i32) -> (i32, i32) {
    %c0_i32 = arith.constant 0 : i32
    %c0_i32_0 = arith.constant 0 : i32
    %c0_i32_1 = arith.constant 0 : i32
    return %c0_i32, %c0_i32_0 : i32, i32
  }
  func.func @transform_7(%arg0: i32) -> (i32, i32) {
    %c0_i32 = arith.constant 0 : i32
    %c0_i32_0 = arith.constant 0 : i32
    %c0_i32_1 = arith.constant 0 : i32
    return %c0_i32, %c0_i32_0 : i32, i32
  }
  func.func @transform_8(%arg0: i32) -> (i32, i32) {
    %c0_i32 = arith.constant 0 : i32
    %c0_i32_0 = arith.constant 0 : i32
    %c0_i32_1 = arith.constant 0 : i32
    return %c0_i32, %c0_i32_0 : i32, i32
  }
  func.func @transform_9(%arg0: i32) -> (i32, i32) {
    %c0_i32 = arith.constant 0 : i32
    %c0_i32_0 = arith.constant 0 : i32
    return %arg0, %c0_i32 : i32, i32
  }
}

module attributes {stable_mosaic.version = 11 : i64} {
  func.func @_mlp_kernel(%arg0: i32, %arg1: memref<8x2352xf32, #tpu.memory_space<vmem>>, %arg2: memref<2352x128xbf16, #tpu.memory_space<vmem>>, %arg3: memref<1x128xf32, #tpu.memory_space<vmem>>, %arg4: memref<128x128xbf16, #tpu.memory_space<vmem>>, %arg5: memref<1x128xf32, #tpu.memory_space<vmem>>, %arg6: memref<128x128xbf16, #tpu.memory_space<vmem>>, %arg7: memref<1x128xf32, #tpu.memory_space<vmem>>, %arg8: memref<128x128xbf16, #tpu.memory_space<vmem>>, %arg9: memref<1x128xf32, #tpu.memory_space<vmem>>, %arg10: memref<8x128xf32, #tpu.memory_space<vmem>>) attributes {dimension_semantics = [#tpu.dimension_semantics<parallel>], iteration_bounds = array<i64: 1>, scalar_prefetch = 0 : i64, scratch_operands = 0 : i64, tpu.core_type = #tpu.core_type<tc>, window_params = [{transform_indices = @transform_0, window_bounds = array<i64: 8, 2352>}, {pipeline_mode = #tpu.pipeline_mode<synchronous>, transform_indices = @transform_1, window_bounds = array<i64: 2352, 128>}, {pipeline_mode = #tpu.pipeline_mode<synchronous>, transform_indices = @transform_2, window_bounds = array<i64: 1, 128>}, {pipeline_mode = #tpu.pipeline_mode<synchronous>, transform_indices = @transform_3, window_bounds = array<i64: 128, 128>}, {pipeline_mode = #tpu.pipeline_mode<synchronous>, transform_indices = @transform_4, window_bounds = array<i64: 1, 128>}, {pipeline_mode = #tpu.pipeline_mode<synchronous>, transform_indices = @transform_5, window_bounds = array<i64: 128, 128>}, {pipeline_mode = #tpu.pipeline_mode<synchronous>, transform_indices = @transform_6, window_bounds = array<i64: 1, 128>}, {pipeline_mode = #tpu.pipeline_mode<synchronous>, transform_indices = @transform_7, window_bounds = array<i64: 128, 128>}, {pipeline_mode = #tpu.pipeline_mode<synchronous>, transform_indices = @transform_8, window_bounds = array<i64: 1, 128>}, {transform_indices = @transform_9, window_bounds = array<i64: 8, 128>}]} {
    %c0 = arith.constant 0 : index
    %c0_0 = arith.constant 0 : index
    %0 = vector.load %arg1[%c0, %c0_0] : memref<8x2352xf32, #tpu.memory_space<vmem>>, vector<8x2352xf32>
    %1 = arith.truncf %0 : vector<8x2352xf32> to vector<8x2352xbf16>
    %c0_1 = arith.constant 0 : index
    %c0_2 = arith.constant 0 : index
    %2 = vector.load %arg2[%c0_1, %c0_2] : memref<2352x128xbf16, #tpu.memory_space<vmem>>, vector<2352x128xbf16>
    %cst = arith.constant dense<0.000000e+00> : vector<8x128xf32>
    %3 = tpu.matmul %1, %2, %cst {dimension_numbers = #tpu.dot_dimension_numbers<[1], [0], [0], [1], [0, 0, 1, 1], [], []>} : vector<8x2352xbf16>, vector<2352x128xbf16>, vector<8x128xf32> -> vector<8x128xf32>
    %c0_3 = arith.constant 0 : index
    %c0_4 = arith.constant 0 : index
    %4 = vector.load %arg3[%c0_3, %c0_4] : memref<1x128xf32, #tpu.memory_space<vmem>>, vector<1x128xf32>
    %5 = vector.broadcast %4 : vector<1x128xf32> to vector<8x128xf32>
    %6 = arith.addf %3, %5 : vector<8x128xf32>
    %cst_5 = arith.constant 0.000000e+00 : f32
    %7 = vector.broadcast %cst_5 : f32 to vector<8x128xf32>
    %8 = arith.maximumf %6, %7 : vector<8x128xf32>
    %9 = arith.truncf %8 : vector<8x128xf32> to vector<8x128xbf16>
    %c0_6 = arith.constant 0 : index
    %c0_7 = arith.constant 0 : index
    %10 = vector.load %arg4[%c0_6, %c0_7] : memref<128x128xbf16, #tpu.memory_space<vmem>>, vector<128x128xbf16>
    %cst_8 = arith.constant dense<0.000000e+00> : vector<8x128xf32>
    %11 = tpu.matmul %9, %10, %cst_8 {dimension_numbers = #tpu.dot_dimension_numbers<[1], [0], [0], [1], [0, 0, 1, 1], [], []>} : vector<8x128xbf16>, vector<128x128xbf16>, vector<8x128xf32> -> vector<8x128xf32>
    %c0_9 = arith.constant 0 : index
    %c0_10 = arith.constant 0 : index
    %12 = vector.load %arg5[%c0_9, %c0_10] : memref<1x128xf32, #tpu.memory_space<vmem>>, vector<1x128xf32>
    %13 = vector.broadcast %12 : vector<1x128xf32> to vector<8x128xf32>
    %14 = arith.addf %11, %13 : vector<8x128xf32>
    %cst_11 = arith.constant 0.000000e+00 : f32
    %15 = vector.broadcast %cst_11 : f32 to vector<8x128xf32>
    %16 = arith.maximumf %14, %15 : vector<8x128xf32>
    %17 = arith.truncf %16 : vector<8x128xf32> to vector<8x128xbf16>
    %c0_12 = arith.constant 0 : index
    %c0_13 = arith.constant 0 : index
    %18 = vector.load %arg6[%c0_12, %c0_13] : memref<128x128xbf16, #tpu.memory_space<vmem>>, vector<128x128xbf16>
    %cst_14 = arith.constant dense<0.000000e+00> : vector<8x128xf32>
    %19 = tpu.matmul %17, %18, %cst_14 {dimension_numbers = #tpu.dot_dimension_numbers<[1], [0], [0], [1], [0, 0, 1, 1], [], []>} : vector<8x128xbf16>, vector<128x128xbf16>, vector<8x128xf32> -> vector<8x128xf32>
    %c0_15 = arith.constant 0 : index
    %c0_16 = arith.constant 0 : index
    %20 = vector.load %arg7[%c0_15, %c0_16] : memref<1x128xf32, #tpu.memory_space<vmem>>, vector<1x128xf32>
    %21 = vector.broadcast %20 : vector<1x128xf32> to vector<8x128xf32>
    %22 = arith.addf %19, %21 : vector<8x128xf32>
    %cst_17 = arith.constant 0.000000e+00 : f32
    %23 = vector.broadcast %cst_17 : f32 to vector<8x128xf32>
    %24 = arith.maximumf %22, %23 : vector<8x128xf32>
    %25 = arith.truncf %24 : vector<8x128xf32> to vector<8x128xbf16>
    %c0_18 = arith.constant 0 : index
    %c0_19 = arith.constant 0 : index
    %26 = vector.load %arg8[%c0_18, %c0_19] : memref<128x128xbf16, #tpu.memory_space<vmem>>, vector<128x128xbf16>
    %cst_20 = arith.constant dense<0.000000e+00> : vector<8x128xf32>
    %27 = tpu.matmul %25, %26, %cst_20 {dimension_numbers = #tpu.dot_dimension_numbers<[1], [0], [0], [1], [0, 0, 1, 1], [], []>} : vector<8x128xbf16>, vector<128x128xbf16>, vector<8x128xf32> -> vector<8x128xf32>
    %c0_21 = arith.constant 0 : index
    %c0_22 = arith.constant 0 : index
    %28 = vector.load %arg9[%c0_21, %c0_22] : memref<1x128xf32, #tpu.memory_space<vmem>>, vector<1x128xf32>
    %29 = vector.broadcast %28 : vector<1x128xf32> to vector<8x128xf32>
    %30 = arith.addf %27, %29 : vector<8x128xf32>
    %c112_i32 = arith.constant 112 : i32
    %31 = tpu.dynamic_rotate %24 by %c112_i32 dim 1 : vector<8x128xf32>, i32 -> vector<8x128xf32>
    %32 = arith.addf %30, %31 : vector<8x128xf32>
    %c0_23 = arith.constant 0 : index
    %c0_24 = arith.constant 0 : index
    %33 = vector.load %arg10[%c0_23, %c0_24] : memref<8x128xf32, #tpu.memory_space<vmem>>, vector<8x128xf32>
    tpu.vector_store %arg10[%c0_23, %c0_24], %32 {strides = array<i32>} : memref<8x128xf32, #tpu.memory_space<vmem>>, vector<8x128xf32>,
    return
  }
  func.func @transform_0(%arg0: i32) -> (i32, i32) {
    %c0_i32 = arith.constant 0 : i32
    %c0_i32_0 = arith.constant 0 : i32
    return %arg0, %c0_i32 : i32, i32
  }
  func.func @transform_1(%arg0: i32) -> (i32, i32) {
    %c0_i32 = arith.constant 0 : i32
    %c0_i32_0 = arith.constant 0 : i32
    %c0_i32_1 = arith.constant 0 : i32
    return %c0_i32, %c0_i32_0 : i32, i32
  }
  func.func @transform_2(%arg0: i32) -> (i32, i32) {
    %c0_i32 = arith.constant 0 : i32
    %c0_i32_0 = arith.constant 0 : i32
    %c0_i32_1 = arith.constant 0 : i32
    return %c0_i32, %c0_i32_0 : i32, i32
  }
  func.func @transform_3(%arg0: i32) -> (i32, i32) {
    %c0_i32 = arith.constant 0 : i32
    %c0_i32_0 = arith.constant 0 : i32
    %c0_i32_1 = arith.constant 0 : i32
    return %c0_i32, %c0_i32_0 : i32, i32
  }
  func.func @transform_4(%arg0: i32) -> (i32, i32) {
    %c0_i32 = arith.constant 0 : i32
    %c0_i32_0 = arith.constant 0 : i32
    %c0_i32_1 = arith.constant 0 : i32
    return %c0_i32, %c0_i32_0 : i32, i32
  }
  func.func @transform_5(%arg0: i32) -> (i32, i32) {
    %c0_i32 = arith.constant 0 : i32
    %c0_i32_0 = arith.constant 0 : i32
    %c0_i32_1 = arith.constant 0 : i32
    return %c0_i32, %c0_i32_0 : i32, i32
  }
  func.func @transform_6(%arg0: i32) -> (i32, i32) {
    %c0_i32 = arith.constant 0 : i32
    %c0_i32_0 = arith.constant 0 : i32
    %c0_i32_1 = arith.constant 0 : i32
    return %c0_i32, %c0_i32_0 : i32, i32
  }
  func.func @transform_7(%arg0: i32) -> (i32, i32) {
    %c0_i32 = arith.constant 0 : i32
    %c0_i32_0 = arith.constant 0 : i32
    %c0_i32_1 = arith.constant 0 : i32
    return %c0_i32, %c0_i32_0 : i32, i32
  }
  func.func @transform_8(%arg0: i32) -> (i32, i32) {
    %c0_i32 = arith.constant 0 : i32
    %c0_i32_0 = arith.constant 0 : i32
    %c0_i32_1 = arith.constant 0 : i32
    return %c0_i32, %c0_i32_0 : i32, i32
  }
  func.func @transform_9(%arg0: i32) -> (i32, i32) {
    %c0_i32 = arith.constant 0 : i32
    %c0_i32_0 = arith.constant 0 : i32
    return %arg0, %c0_i32 : i32, i32
  }
}

</mosaic_0001>

<bundles_post_ra>
// kernel: tpu_custom_call.1
= control target key start
LH: loop header
LB: loop body
LE: loop exit
PB: predicated region body
PF: predicated region fallthrough
CT: control target
= control target key end

     0   :  { %14 = vsyncpa [#allocation3], 0  ;;  %s3294_s0 = inlined_call_operand.hbm [shape: f32[2,2352], index: 0, kind: input, shape index: {}]   ;;  %s3295_s1 = inlined_call_operand.hbm [shape: bf16[2352,128], index: 1, kind: input, shape index: {}]   ;;  %s3296_s2 = inlined_call_operand.vmem [shape: f32[1,128], index: 2, kind: input, shape index: {}]   ;;  %s3297_s3 = inlined_call_operand.hbm [shape: bf16[128,128], index: 3, kind: input, shape index: {}]   ;;  %s3298_s4 = inlined_call_operand.vmem [shape: f32[1,128], index: 4, kind: input, shape index: {}]   ;;  %s3299_s5 = inlined_call_operand.hbm [shape: bf16[128,128], index: 5, kind: input, shape index: {}]   ;;  %s3300_s6 = inlined_call_operand.vmem [shape: f32[1,128], index: 6, kind: input, shape index: {}]   ;;  %s3301_s7 = inlined_call_operand.hbm [shape: bf16[128,128], index: 7, kind: input, shape index: {}]   ;;  %s3302_s8 = inlined_call_operand.vmem [shape: f32[1,128], index: 8, kind: input, shape index: {}]   ;;  %s3303_s9 = inlined_call_operand.hbm [shape: f32[2,128], index: 9, kind: output, shape index: {}]  }
   0x1   :  { %15 = vsyncpa [#allocation6], 0 }
   0x2   :  { %16 = vsyncpa [#allocation9], 0 }
   0x3   :  { %17 = vsyncpa [#allocation4], 0 }
   0x4   :  { %22 = vsyncadd [#allocation3], 1824  ;;  %s3128_s30 = smov [#allocation5]  }
   0x5   :  { %s35_s10 = sshll.u32 %s3128_s30, 4  ;;  %s36_s10 = int_to_ptr.vmem [resolvable:$true] %s35_s10 }
   0x6   :  { %s3008_s11 = scalar_lea.vmem %s36_s10, 18816  ;;  %p3013_p1 = scmp.lt.s32.totalorder %s36_s10, %s36_s10 }
   0x7   :  { %p3009_p0 = scmp.ne.s32.totalorder %s36_s10, %s3008_s11  ;;  %p3014_p2 = scmp.lt.s32.totalorder %s3008_s11, %s3008_s11 }
   0x9   :  { %p3015_p3 = por %p3014_p2, %p3013_p1 }
   0xb   :  { %p3016_p4 = pnand %p3015_p3, %p3009_p0 }
   0xd   :  { %3019 = shalt.err (!%p3016_p4)
}
   0xe   :  { %s3129_s12 = smov 64   ;;  %s3130_s13 = smov 4  }
   0xf   :  { %41 = dma.hbm_to_vmem [thread:$0]  %s3295_s1, 18816, %s36_s10, [#allocation6], %s3129_s12, %s3129_s12, %s3130_s13  }
  0x10   :  { %s3131_s16 = smov [#allocation8]   ;;  %s3132_s18 = smov [#allocation2]  }
  0x11   :  { %s63_s17 = sshll.u32 %s3131_s16, 4  ;;  %s23_s19 = sshll.u32 %s3132_s18, 4  ;;  %s64_s17 = int_to_ptr.vmem [resolvable:$true] %s63_s17  ;;  %s24_s19 = int_to_ptr.vmem [resolvable:$true] %s23_s19 }
  0x12   :  { %s3028_s20 = scalar_lea.vmem %s64_s17, 1024  ;;  %p3033_p6 = scmp.lt.s32.totalorder %s64_s17, %s64_s17 }
  0x13   :  { %p3029_p5 = scmp.ne.s32.totalorder %s64_s17, %s3028_s20  ;;  %p3034_p7 = scmp.lt.s32.totalorder %s3028_s20, %s3028_s20 }
  0x15   :  { %p3035_p8 = por %p3034_p7, %p3033_p6 }
  0x17   :  { %p3036_p9 = pnand %p3035_p8, %p3029_p5 }
  0x19   :  { %3039 = shalt.err (!%p3036_p9)
}
  0x1a   :  { %69 = dma.hbm_to_vmem [thread:$0]  %s3299_s5, 1024, %s64_s17, [#allocation9], %s3129_s12, %s3129_s12, %s3130_s13  }
  0x1b   :  { %s3048_s1 = scalar_lea.vmem %s24_s19, 608  ;;  %s3052_s23 = scalar_lea.vmem %s24_s19, 2432 }
  0x1c   :  { %p3049_p10 = scmp.ne.s32.totalorder %s24_s19, %s3048_s1  ;;  %p3053_p11 = scmp.lt.s32.totalorder %s24_s19, %s24_s19 }
  0x1d   :  { %p3054_p12 = scmp.lt.s32.totalorder %s3052_s23, %s3048_s1 }
  0x1f   :  { %p3055_p13 = por %p3054_p12, %p3053_p11 }
  0x21   :  { %p3056_p0 = pnand %p3055_p13, %p3049_p10 }
  0x23   :  { %3059 = shalt.err (!%p3056_p0)
}
  0x24   :  { %s3133_s24 = smov 608   ;;  %s3134_s25 = smov 38  }
  0x25   :  { %29 = dma.hbm_to_vmem [thread:$0]  %s3294_s0, 608, %s24_s19, [#allocation3], %s3133_s24, %s3133_s24, %s3134_s25  }
  0x26   :  { %s3135_s28 = smov [#allocation7]   ;;  %s3136_s30 = smov [#allocation10]  }
  0x27   :  { %s49_s29 = sshll.u32 %s3135_s28, 4  ;;  %s77_s5 = sshll.u32 %s3136_s30, 4  ;;  %s50_s29 = int_to_ptr.vmem [resolvable:$true] %s49_s29  ;;  %s78_s5 = int_to_ptr.vmem [resolvable:$true] %s77_s5 }
  0x28   :  { %s3068_s10 = scalar_lea.vmem %s50_s29, 1024  ;;  %p3073_p2 = scmp.lt.s32.totalorder %s50_s29, %s50_s29 }
  0x29   :  { %p3069_p1 = scmp.ne.s32.totalorder %s50_s29, %s3068_s10  ;;  %p3074_p3 = scmp.lt.s32.totalorder %s3068_s10, %s3068_s10 }
  0x2b   :  { %p3075_p4 = por %p3074_p3, %p3073_p2 }
  0x2d   :  { %p3076_p5 = pnand %p3075_p4, %p3069_p1 }
  0x2f   :  { %3079 = shalt.err (!%p3076_p5)
}
  0x30   :  { %55 = dma.hbm_to_vmem [thread:$0]  %s3297_s3, 1024, %s50_s29, [#allocation6], %s3129_s12, %s3129_s12, %s3130_s13  }
  0x31   :  { %s3088_s0 = scalar_lea.vmem %s78_s5, 1024  ;;  %p3093_p7 = scmp.lt.s32.totalorder %s78_s5, %s78_s5 }
  0x32   :  { %p3089_p6 = scmp.ne.s32.totalorder %s78_s5, %s3088_s0  ;;  %p3094_p8 = scmp.lt.s32.totalorder %s3088_s0, %s3088_s0 }
  0x34   :  { %p3095_p9 = por %p3094_p8, %p3093_p7 }
  0x36   :  { %p3096_p10 = pnand %p3095_p9, %p3089_p6 }
  0x38   :  { %3099 = shalt.err (!%p3096_p10)
}
  0x39   :  { %83 = dma.hbm_to_vmem [thread:$0]  %s3301_s7, 1024, %s78_s5, [#allocation9], %s3129_s12, %s3129_s12, %s3130_s13  }
  0x3a   :  { %3120 = dma.done.wait [#allocation3], 2432  }
  0x3b   :  { %3121 = vsyncadd [#allocation3], 4294964864 }
  0x3c   :  { %3122 = dma.done.wait [#allocation6], 19840  }
  0x3d   :  { %3123 = vsyncadd [#allocation6], 4294947456 }
  0x3e   :  { %3124 = dma.done.wait [#allocation9], 2048  }
  0x3f   :  { %3125 = vsyncadd [#allocation9], 4294965248  ;;  %v2799_v0 = vld [vmem:[#allocation5 + $0x78] sm:$0xff]   ;;  %v2803_v4 = vld [vmem:[#allocation5 + $0x70] sm:$0xff]   ;;  %v3137_v23 = vmov 1983009808   ;;  %v149_v25 = vlaneseq }
  0x40   :  { %v2800_v1 = vld [vmem:[#allocation5 + $0x38] sm:$0xff]   ;;  %2484 = vmatprep.subr.bf16.mxu0 %v2799_v0  ;;  %v2804_v5 = vld [vmem:[#allocation5 + $0x30] sm:$0xff]   ;;  %v2807_v8 = vld [vmem:[#allocation5 + $0x68] sm:$0xff]   ;;  %v147_v24 = vunpack.c.l.s4 %v3137_v23  ;;  %vm3139_vm0 = vmmov 0   ;;  %vm1542_vm1 = vcmask 392192  }
  0x41   :  { %v2801_v2 = vld [vmem:[#allocation5 + $0xf8] sm:$0xff]   ;;  %2485 = vmatpush3.bf16.msra.mxu0 %v2800_v1  ;;  %v2805_v6 = vld [vmem:[#allocation5 + $0xf0] sm:$0xff]   ;;  %v2808_v9 = vld [vmem:[#allocation5 + $0x28] sm:$0xff]   ;;  %v150_v31 = vshrl.u32 %v149_v25, 7 }
  0x42   :  { %v2802_v3 = vld [vmem:[#allocation5 + $0xb8] sm:$0xff]   ;;  %2506 = vmatprep.subr.bf16.mxu1 %v2801_v2  ;;  %2486 = vmatprep.subr.bf16.mxu0 %v2803_v4  ;;  %v2806_v7 = vld [vmem:[#allocation5 + $0xb0] sm:$0xff]   ;;  %v2809_v10 = vld [vmem:[#allocation5 + $0xe8] sm:$0xff]   ;;  %v148_v30 = vunpack.c.0.s8 %v147_v24 }
  0x43   :  { %2507 = vmatpush3.bf16.msra.mxu1 %v2802_v3  ;;  %v2810_v11 = vld [vmem:[#allocation5 + $0xa8] sm:$0xff]   ;;  %v2811_v12 = vld [vmem:[#allocation5 + $0x60] sm:$0xff]   ;;  %v2815_v16 = vld [vmem:[#allocation5 + $0x58] sm:$0xff]  }
  0x44   :  { %2508 = vmatprep.subr.bf16.mxu1 %v2805_v6  ;;  %v2812_v13 = vld [vmem:[#allocation5 + $0x20] sm:$0xff]   ;;  %v2816_v17 = vld [vmem:[#allocation5 + $0x18] sm:$0xff]   ;;  %v2819_v20 = vld [vmem:[#allocation5 + $0x50] sm:$0xff]   ;;  %v3221_v36 = vsub.s32 %v148_v30, %v150_v31 }
  0x45   :  { %2487 = vmatpush3.bf16.msra.mxu0 %v2804_v5  ;;  %v2813_v14 = vld [vmem:[#allocation5 + $0xe0] sm:$0xff]   ;;  %v2817_v18 = vld [vmem:[#allocation5 + $0xd8] sm:$0xff]   ;;  %v2820_v21 = vld [vmem:[#allocation5 + $0x10] sm:$0xff]  }
  0x46   :  { %2488 = vmatprep.subr.bf16.mxu0 %v2807_v8  ;;  %v2814_v15 = vld [vmem:[#allocation5 + $0xa0] sm:$0xff]   ;;  %v2818_v19 = vld [vmem:[#allocation5 + $0x98] sm:$0xff]   ;;  %v2821_v22 = vld [vmem:[#allocation5 + $0xd0] sm:$0xff]  }
  0x47   :  { %2509 = vmatpush3.bf16.msra.mxu1 %v2806_v7  ;;  %v2822_v26 = vld [vmem:[#allocation5 + $0x90] sm:$0xff]   ;;  %v2823_v27 = vld [vmem:[#allocation5 + $0x48] sm:$0xff]   ;;  %v2827_v33 = vld [vmem:[#allocation5 + $0x40] sm:$0xff]  }
  0x48   :  { %2510 = vmatprep.subr.bf16.mxu1 %v2809_v10  ;;  %v2824_v28 = vld [vmem:[#allocation5 + $0x8] sm:$0xff]   ;;  %v2828_v34 = vld [vmem:[#allocation5] sm:$0xff]   ;;  %v2832_v38 = vld [vmem:[#allocation2 + $0x4c] ss:$38 sps:$4 sm:$0xff]  }
  0x49   :  { %2489 = vmatpush3.bf16.msra.mxu0 %v2808_v9  ;;  %v2825_v29 = vld [vmem:[#allocation5 + $0xc8] sm:$0xff]   ;;  %v2829_v35 = vld [vmem:[#allocation5 + $0xc0] sm:$0xff]   ;;  %v166_v41 = vrot.slane %v2832_v38, %v3221_v36  ;;  %v2835_v42 = vld [vmem:[#allocation5 + $0x178] sm:$0xff]  }
  0x4a   :  { %2490 = vmatprep.subr.bf16.mxu0 %v2811_v12  ;;  %v2826_v32 = vld [vmem:[#allocation5 + $0x88] sm:$0xff]   ;;  %v2834_v39 = vld [vmem:[#allocation5 + $0x80] sm:$0xff]   ;;  %v2839_v49 = vld [vmem:[#allocation5 + $0x1f8] sm:$0xff]  }
  0x4b   :  { %2511 = vmatpush3.bf16.msra.mxu1 %v2810_v11  ;;  %v2830_v37 = vld [vmem:[#allocation2] ss:$38 sps:$4 sm:$0xff]   ;;  %v2837_v44 = vld [vmem:[#allocation2 + $0x50] ss:$38 sps:$4 sm:$0xff]  }
  0x4c   :  { %2512 = vmatprep.subr.bf16.mxu1 %v2813_v14  ;;  %v152_v40 = vrot.slane %v2830_v37, %v3221_v36  ;;  %v2836_v43 = vld [vmem:[#allocation2 + $0x4] ss:$38 sps:$4 sm:$0xff]   ;;  %v173_v48 = vrot.slane %v2837_v44, %v3221_v36  ;;  %v2838_v52 = vld [vmem:[#allocation5 + $0x138] sm:$0xff]   ;;  %v2849_v1 = vld [vmem:[#allocation5 + $0x160] sm:$0xff]  }
  0x4d   :  { %2491 = vmatpush3.bf16.msra.mxu0 %v2812_v13  ;;  %v159_v47 = vrot.slane %v2836_v43, %v3221_v36  ;;  %v2841_v55 = vld [vmem:[#allocation5 + $0x170] sm:$0xff]   ;;  %v2840_v56 = vld [vmem:[#allocation5 + $0x1b8] sm:$0xff]   ;;  %v2845_v61 = vld [vmem:[#allocation5 + $0x168] sm:$0xff]  }
  0x4e   :  { %2492 = vmatprep.subr.bf16.mxu0 %v2815_v16  ;;  %v175_v45 = vcombine.high %v152_v40, %v166_v41  ;;  %v174_v46 = vcombine.low %v152_v40, %v166_v41  ;;  %v2842_v59 = vld [vmem:[#allocation5 + $0x130] sm:$0xff]   ;;  %v2846_v63 = vld [vmem:[#allocation5 + $0x128] sm:$0xff]   ;;  %v2850_v3 = vld [vmem:[#allocation5 + $0x120] sm:$0xff]  }
  0x4f   :  { %2513 = vmatpush3.bf16.msra.mxu1 %v2814_v15  ;;  %v177_v53 = vcombine.high %v159_v47, %v173_v48  ;;  %v176_v54 = vcombine.low %v159_v47, %v173_v48  ;;  %v2843_v60 = vld [vmem:[#allocation5 + $0x1f0] sm:$0xff]   ;;  %v2847_v0 = vld [vmem:[#allocation5 + $0x1e8] sm:$0xff]   ;;  %v2851_v4 = vld [vmem:[#allocation5 + $0x1e0] sm:$0xff]  }
  0x50   :  { %2514 = vmatprep.subr.bf16.mxu1 %v2817_v18  ;;  %v341_v50 = vpack.c.bf16 %v175_v45, %v175_v45  ;;  %v340_v51 = vpack.c.bf16 %v174_v46, %v174_v46  ;;  %v2844_v62 = vld [vmem:[#allocation5 + $0x1b0] sm:$0xff]   ;;  %v2848_v2 = vld [vmem:[#allocation5 + $0x1a8] sm:$0xff]   ;;  %v2853_v5 = vld [vmem:[#allocation5 + $0x158] sm:$0xff]  }
  0x51   :  { %2493 = vmatpush3.bf16.msra.mxu0 %v2816_v17  ;;  %v343_v57 = vpack.c.bf16 %v177_v53, %v177_v53  ;;  %v342_v58 = vpack.c.bf16 %v176_v54, %v176_v54  ;;  %v2852_v6 = vld [vmem:[#allocation5 + $0x1a0] sm:$0xff]   ;;  %v2854_v7 = vld [vmem:[#allocation5 + $0x118] sm:$0xff]   ;;  %v2857_v9 = vld [vmem:[#allocation5 + $0x150] sm:$0xff]  }
  0x52   :  { %2494 = vmatprep.subr.bf16.mxu0 %v2819_v20  ;;  %1578 = vmatprep.mubr.bf16.mxu0 %v341_v50  ;;  %v2855_v8 = vld [vmem:[#allocation5 + $0x1d8] sm:$0xff]   ;;  %v2858_v11 = vld [vmem:[#allocation5 + $0x110] sm:$0xff]   ;;  %v2861_v13 = vld [vmem:[#allocation5 + $0x148] sm:$0xff]  }
  0x53   :  { %2515 = vmatpush3.bf16.msra.mxu1 %v2818_v19  ;;  %1618 = vmatprep.mubr.bf16.mxu1 %v343_v57  ;;  %v2856_v10 = vld [vmem:[#allocation5 + $0x198] sm:$0xff]   ;;  %v2859_v12 = vld [vmem:[#allocation5 + $0x1d0] sm:$0xff]   ;;  %v2862_v15 = vld [vmem:[#allocation5 + $0x108] sm:$0xff]  }
  0x54   :  { %2516 = vmatprep.subr.bf16.mxu1 %v2821_v22  ;;  %v2860_v14 = vld [vmem:[#allocation5 + $0x190] sm:$0xff]   ;;  %v2863_v16 = vld [vmem:[#allocation5 + $0x1c8] sm:$0xff]   ;;  %v2865_v18 = vld [vmem:[#allocation5 + $0x140] sm:$0xff]  }
  0x55   :  { %2495 = vmatpush3.bf16.msra.mxu0 %v2820_v21  ;;  %v2864_v17 = vld [vmem:[#allocation5 + $0x188] sm:$0xff]   ;;  %v2866_v19 = vld [vmem:[#allocation5 + $0x100] sm:$0xff]   ;;  %v2868_v21 = vld [vmem:[#allocation2 + $0x8] ss:$38 sps:$4 sm:$0xff]  }
  0x56   :  { %2496 = vmatprep.subr.bf16.mxu0 %v2823_v27  ;;  %v2867_v20 = vld [vmem:[#allocation5 + $0x1c0] sm:$0xff]   ;;  %v188_v24 = vrot.slane %v2868_v21, %v3221_v36  ;;  %v2874_v27 = vld [vmem:[#allocation2 + $0xc] ss:$38 sps:$4 sm:$0xff]   ;;  %v2883_v46 = vld [vmem:[#allocation5 + $0x268] sm:$0xff]  }
  0x57   :  { %2517 = vmatpush3.bf16.msra.mxu1 %v2822_v26  ;;  %v2870_v22 = vld [vmem:[#allocation2 + $0x54] ss:$38 sps:$4 sm:$0xff]   ;;  %v195_v31 = vrot.slane %v2874_v27, %v3221_v36  ;;  %v2879_v40 = vld [vmem:[#allocation5 + $0x270] sm:$0xff]   ;;  %v2884_v48 = vld [vmem:[#allocation5 + $0x228] sm:$0xff]  }
  0x58   :  { %2518 = vmatprep.subr.bf16.mxu1 %v2825_v29  ;;  %v2872_v23 = vld [vmem:[#allocation5 + $0x180] sm:$0xff]   ;;  %v202_v25 = vrot.slane %v2870_v22, %v3221_v36  ;;  %v2873_v26 = vld [vmem:[#allocation5 + $0x278] sm:$0xff]   ;;  %v2880_v44 = vld [vmem:[#allocation5 + $0x230] sm:$0xff]  }
  0x59   :  { %2497 = vmatpush3.bf16.msra.mxu0 %v2824_v28  ;;  %v2875_v28 = vld [vmem:[#allocation2 + $0x58] ss:$38 sps:$4 sm:$0xff]   ;;  %v2876_v37 = vld [vmem:[#allocation5 + $0x238] sm:$0xff]   ;;  %v2881_v45 = vld [vmem:[#allocation5 + $0x2f0] sm:$0xff]  }
  0x5a   :  { %2498 = vmatprep.subr.bf16.mxu0 %v2827_v33  ;;  %v211_v29 = vcombine.high %v188_v24, %v202_v25  ;;  %v210_v30 = vcombine.low %v188_v24, %v202_v25  ;;  %v2877_v33 = vld [vmem:[#allocation5 + $0x2f8] sm:$0xff]   ;;  %v2882_v47 = vld [vmem:[#allocation5 + $0x2b0] sm:$0xff]   ;;  %v2887_v50 = vld [vmem:[#allocation5 + $0x260] sm:$0xff]  }
  0x5b   :  { %2519 = vmatpush3.bf16.msra.mxu1 %v2826_v32  ;;  %v209_v32 = vrot.slane %v2875_v28, %v3221_v36  ;;  %v2878_v41 = vld [vmem:[#allocation5 + $0x2b8] sm:$0xff]   ;;  %v2889_v53 = vld [vmem:[#allocation5 + $0x2e0] sm:$0xff]   ;;  %v2917_v25 = vld [vmem:[#allocation5 + $0x370] sm:$0xff]  }
  0x5c   :  { %2520 = vmatprep.subr.bf16.mxu1 %v2829_v35  ;;  %v344_v35 = vpack.c.bf16 %v210_v30, %v210_v30  ;;  %v2891_v54 = vld [vmem:[#allocation5 + $0x258] sm:$0xff]   ;;  %v2918_v28 = vld [vmem:[#allocation5 + $0x330] sm:$0xff]  }
  0x5d   :  { %2499 = vmatpush3.bf16.msra.mxu0 %v2828_v34  ;;  %v345_v34 = vpack.c.bf16 %v211_v29, %v211_v29  ;;  %v213_v38 = vcombine.high %v195_v31, %v209_v32  ;;  %v2893_v57 = vld [vmem:[#allocation5 + $0x2d8] sm:$0xff]   ;;  %v2919_v29 = vld [vmem:[#allocation5 + $0x3f0] sm:$0xff]  }
  0x5e   :  { %2528 = vmatprep.subr.bf16.mxu0 %v2835_v42  ;;  %v2916_v24 = vld [vmem:[#allocation5 + $0x3b8] sm:$0xff]   ;;  %v2920_v30 = vld [vmem:[#allocation5 + $0x3b0] sm:$0xff]  }
  0x5f   :  { %2521 = vmatpush3.bf16.msra.mxu1 %v2834_v39  ;;  %v212_v39 = vcombine.low %v195_v31, %v209_v32  ;;  %v347_v42 = vpack.c.bf16 %v213_v38, %v213_v38  ;;  %v2921_v31 = vld [vmem:[#allocation5 + $0x368] sm:$0xff]   ;;  %v2927_v38 = vld [vmem:[#allocation5 + $0x3e0] sm:$0xff]  }
  0x60   :  { %2550 = vmatprep.subr.bf16.mxu1 %v2839_v49  ;;  %1579 = vmatmul.mubr.bf16.vlgmr.msra.gmra.mxu0 %v340_v51  ;;  %v2885_v49 = vld [vmem:[#allocation5 + $0x2e8] sm:$0xff]  }
  0x61   :  { %2529 = vmatpush3.bf16.msra.mxu0 %v2838_v52  ;;  %1658 = vmatprep.mubr.bf16.mxu0 %v345_v34  ;;  %v346_v43 = vpack.c.bf16 %v212_v39, %v212_v39  ;;  %v2886_v51 = vld [vmem:[#allocation5 + $0x2a8] sm:$0xff]   ;;  %v2888_v52 = vld [vmem:[#allocation5 + $0x220] sm:$0xff]  }
  0x62   :  { %2530 = vmatprep.subr.bf16.mxu0 %v2841_v55  ;;  %1619 = vmatmul.mubr.bf16.vlgmr.msra.gmra.mxu1 %v342_v58  ;;  %v2890_v55 = vld [vmem:[#allocation5 + $0x2a0] sm:$0xff]   ;;  %v2895_v58 = vld [vmem:[#allocation5 + $0x250] sm:$0xff]   ;;  %v2922_v32 = vld [vmem:[#allocation5 + $0x328] sm:$0xff]  }
  0x63   :  { %2551 = vmatpush3.bf16.msra.mxu1 %v2840_v56  ;;  %1698 = vmatprep.mubr.bf16.mxu1 %v347_v42  ;;  %v2892_v56 = vld [vmem:[#allocation5 + $0x218] sm:$0xff]   ;;  %v2924_v34 = vld [vmem:[#allocation5 + $0x3a8] sm:$0xff]   ;;  %v2928_v39 = vld [vmem:[#allocation5 + $0x3a0] sm:$0xff]  }
  0x64   :  { %2552 = vmatprep.subr.bf16.mxu1 %v2843_v60  ;;  %v2896_v60 = vld [vmem:[#allocation5 + $0x210] sm:$0xff]   ;;  %v2931_v42 = vld [vmem:[#allocation5 + $0x3d8] sm:$0xff]  }
  0x65   :  { %2531 = vmatpush3.bf16.msra.mxu0 %v2842_v59  ;;  %v2894_v59 = vld [vmem:[#allocation5 + $0x298] sm:$0xff]  }
  0x66   :  { %2532 = vmatprep.subr.bf16.mxu0 %v2845_v61  ;;  %v2897_v61 = vld [vmem:[#allocation5 + $0x2d0] sm:$0xff]  }
  0x67   :  { %2553 = vmatpush3.bf16.msra.mxu1 %v2844_v62  ;;  %v2899_v62 = vld [vmem:[#allocation5 + $0x248] sm:$0xff]  }
  0x68   :  { %2554 = vmatprep.subr.bf16.mxu1 %v2847_v0  ;;  %v2900_v0 = vld [vmem:[#allocation5 + $0x208] sm:$0xff]  }
  0x69   :  { %2533 = vmatpush3.bf16.msra.mxu0 %v2846_v63  ;;  %v2898_v63 = vld [vmem:[#allocation5 + $0x290] sm:$0xff]  }
  0x6a   :  { %2534 = vmatprep.subr.bf16.mxu0 %v2849_v1  ;;  %v2901_v1 = vld [vmem:[#allocation5 + $0x2c8] sm:$0xff]  }
  0x6b   :  { %2555 = vmatpush3.bf16.msra.mxu1 %v2848_v2  ;;  %v2902_v2 = vld [vmem:[#allocation5 + $0x288] sm:$0xff]  }
  0x6c   :  { %2556 = vmatprep.subr.bf16.mxu1 %v2851_v4  ;;  %v2904_v4 = vld [vmem:[#allocation5 + $0x200] sm:$0xff]  }
  0x6d   :  { %2535 = vmatpush3.bf16.msra.mxu0 %v2850_v3  ;;  %v2903_v3 = vld [vmem:[#allocation5 + $0x240] sm:$0xff]  }
  0x6e   :  { %2536 = vmatprep.subr.bf16.mxu0 %v2853_v5  ;;  %v2905_v5 = vld [vmem:[#allocation5 + $0x2c0] sm:$0xff]  }
  0x6f   :  { %2557 = vmatpush3.bf16.msra.mxu1 %v2852_v6  ;;  %v2906_v6 = vld [vmem:[#allocation2 + $0x10] ss:$38 sps:$4 sm:$0xff]  }
  0x70   :  { %2558 = vmatprep.subr.bf16.mxu1 %v2855_v8  ;;  %v224_v8 = vrot.slane %v2906_v6, %v3221_v36 }
  0x71   :  { %2537 = vmatpush3.bf16.msra.mxu0 %v2854_v7  ;;  %v2908_v7 = vld [vmem:[#allocation2 + $0x5c] ss:$38 sps:$4 sm:$0xff]  }
  0x72   :  { %2538 = vmatprep.subr.bf16.mxu0 %v2857_v9  ;;  %v2910_v9 = vld [vmem:[#allocation5 + $0x280] sm:$0xff]  }
  0x73   :  { %2559 = vmatpush3.bf16.msra.mxu1 %v2856_v10  ;;  %v238_v10 = vrot.slane %v2908_v7, %v3221_v36 }
  0x74   :  { %2560 = vmatprep.subr.bf16.mxu1 %v2859_v12  ;;  %v2912_v12 = vld [vmem:[#allocation2 + $0x14] ss:$38 sps:$4 sm:$0xff]  }
  0x75   :  { %2539 = vmatpush3.bf16.msra.mxu0 %v2858_v11  ;;  %v2911_v11 = vld [vmem:[#allocation5 + $0x378] sm:$0xff]  }
  0x76   :  { %2540 = vmatprep.subr.bf16.mxu0 %v2861_v13  ;;  %v2913_v13 = vld [vmem:[#allocation2 + $0x60] ss:$38 sps:$4 sm:$0xff]  }
  0x77   :  { %2561 = vmatpush3.bf16.msra.mxu1 %v2860_v14  ;;  %v247_v14 = vcombine.high %v224_v8, %v238_v10 }
  0x78   :  { %2562 = vmatprep.subr.bf16.mxu1 %v2863_v16  ;;  %v231_v16 = vrot.slane %v2912_v12, %v3221_v36  ;;  %v2954_v12 = vld [vmem:[#allocation5 + $0x430] sm:$0xff]  }
  0x79   :  { %2541 = vmatpush3.bf16.msra.mxu0 %v2862_v15  ;;  %v246_v15 = vcombine.low %v224_v8, %v238_v10  ;;  %v2953_v8 = vld [vmem:[#allocation5 + $0x470] sm:$0xff]  }
  0x7a   :  { %2542 = vmatprep.subr.bf16.mxu0 %v2865_v18  ;;  %v2915_v18 = vld [vmem:[#allocation5 + $0x3f8] sm:$0xff]  }
  0x7b   :  { %2563 = vmatpush3.bf16.msra.mxu1 %v2864_v17  ;;  %v245_v17 = vrot.slane %v2913_v13, %v3221_v36  ;;  %v348_v21 = vpack.c.bf16 %v246_v15, %v246_v15  ;;  %v2955_v13 = vld [vmem:[#allocation5 + $0x468] sm:$0xff]   ;;  %v2957_v15 = vld [vmem:[#allocation5 + $0x460] sm:$0xff]  }
  0x7c   :  { %2564 = vmatprep.subr.bf16.mxu1 %v2867_v20  ;;  %v349_v20 = vpack.c.bf16 %v247_v14, %v247_v14  ;;  %v2956_v14 = vld [vmem:[#allocation5 + $0x428] sm:$0xff]  }
  0x7d   :  { %2543 = vmatpush3.bf16.msra.mxu0 %v2866_v19  ;;  %v2914_v19 = vld [vmem:[#allocation5 + $0x338] sm:$0xff]   ;;  %v249_v22 = vcombine.high %v231_v16, %v245_v17 }
  0x7e   :  { %2572 = vmatprep.subr.bf16.mxu0 %v2873_v26 }
  0x7f   :  { %2565 = vmatpush3.bf16.msra.mxu1 %v2872_v23  ;;  %v248_v23 = vcombine.low %v231_v16, %v245_v17  ;;  %v351_v26 = vpack.c.bf16 %v249_v22, %v249_v22  ;;  %v2963_v16 = vld [vmem:[#allocation5 + $0x490] sm:$0xff]   ;;  %v2958_v17 = vld [vmem:[#allocation5 + $0x420] sm:$0xff]  }
  0x80   :  { %2594 = vmatprep.subr.bf16.mxu1 %v2877_v33  ;;  %1659 = vmatmul.mubr.bf16.vlgmr.msra.gmra.mxu0 %v344_v35  ;;  %v2923_v33 = vld [vmem:[#allocation5 + $0x3e8] sm:$0xff]   ;;  %v2925_v35 = vld [vmem:[#allocation5 + $0x360] sm:$0xff]   ;;  %v2961_v22 = vld [vmem:[#allocation5 + $0x450] sm:$0xff]  }
  0x81   :  { %2573 = vmatpush3.bf16.msra.mxu0 %v2876_v37  ;;  %1738 = vmatprep.mubr.bf16.mxu0 %v349_v20  ;;  %v350_v27 = vpack.c.bf16 %v248_v23, %v248_v23  ;;  %v2926_v37 = vld [vmem:[#allocation5 + $0x320] sm:$0xff]   ;;  %v2960_v20 = vld [vmem:[#allocation5 + $0x418] sm:$0xff]   ;;  %v2970_v23 = vld [vmem:[#allocation2 + $0x20] ss:$38 sps:$4 sm:$0xff]  }
  0x82   :  { %2574 = vmatprep.subr.bf16.mxu0 %v2879_v40  ;;  %1699 = vmatmul.mubr.bf16.vlgmr.msra.gmra.mxu1 %v346_v43  ;;  %v2929_v40 = vld [vmem:[#allocation5 + $0x358] sm:$0xff]  }
  0x83   :  { %2595 = vmatpush3.bf16.msra.mxu1 %v2878_v41  ;;  %1778 = vmatprep.mubr.bf16.mxu1 %v351_v26  ;;  %v2930_v41 = vld [vmem:[#allocation5 + $0x318] sm:$0xff]  }
  0x84   :  { %2596 = vmatprep.subr.bf16.mxu1 %v2881_v45  ;;  %v2932_v43 = vld [vmem:[#allocation5 + $0x398] sm:$0xff]   ;;  %v2934_v45 = vld [vmem:[#allocation5 + $0x310] sm:$0xff]  }
  0x85   :  { %2575 = vmatpush3.bf16.msra.mxu0 %v2880_v44  ;;  %v2933_v44 = vld [vmem:[#allocation5 + $0x350] sm:$0xff]  }
  0x86   :  { %2576 = vmatprep.subr.bf16.mxu0 %v2883_v46  ;;  %v2935_v46 = vld [vmem:[#allocation5 + $0x3d0] sm:$0xff]  }
  0x87   :  { %2597 = vmatpush3.bf16.msra.mxu1 %v2882_v47  ;;  %v2936_v47 = vld [vmem:[#allocation5 + $0x390] sm:$0xff]  }
  0x88   :  { %2598 = vmatprep.subr.bf16.mxu1 %v2885_v49  ;;  %v2938_v49 = vld [vmem:[#allocation5 + $0x308] sm:$0xff]   ;;  %v2973_v26 = vld [vmem:[#allocation2 + $0x6c] ss:$38 sps:$4 sm:$0xff]  }
  0x89   :  { %2577 = vmatpush3.bf16.msra.mxu0 %v2884_v48  ;;  %v2937_v48 = vld [vmem:[#allocation5 + $0x348] sm:$0xff]  }
  0x8a   :  { %2578 = vmatprep.subr.bf16.mxu0 %v2887_v50  ;;  %v2939_v50 = vld [vmem:[#allocation5 + $0x3c8] sm:$0xff]  }
  0x8b   :  { %2599 = vmatpush3.bf16.msra.mxu1 %v2886_v51  ;;  %v2940_v51 = vld [vmem:[#allocation5 + $0x388] sm:$0xff]  }
  0x8c   :  { %2600 = vmatprep.subr.bf16.mxu1 %v2889_v53  ;;  %v2942_v53 = vld [vmem:[#allocation5 + $0x300] sm:$0xff]  }
  0x8d   :  { %2579 = vmatpush3.bf16.msra.mxu0 %v2888_v52  ;;  %v2941_v52 = vld [vmem:[#allocation5 + $0x340] sm:$0xff]  }
  0x8e   :  { %2580 = vmatprep.subr.bf16.mxu0 %v2891_v54  ;;  %v2943_v54 = vld [vmem:[#allocation5 + $0x3c0] sm:$0xff]  }
  0x8f   :  { %2601 = vmatpush3.bf16.msra.mxu1 %v2890_v55  ;;  %v2944_v55 = vld [vmem:[#allocation2 + $0x18] ss:$38 sps:$4 sm:$0xff]  }
  0x90   :  { %2602 = vmatprep.subr.bf16.mxu1 %v2893_v57  ;;  %v2948_v57 = vld [vmem:[#allocation5 + $0x380] sm:$0xff]  }
  0x91   :  { %2581 = vmatpush3.bf16.msra.mxu0 %v2892_v56  ;;  %v2946_v56 = vld [vmem:[#allocation2 + $0x64] ss:$38 sps:$4 sm:$0xff]  }
  0x92   :  { %2582 = vmatprep.subr.bf16.mxu0 %v2895_v58  ;;  %v260_v58 = vrot.slane %v2944_v55, %v3221_v36 }
  0x93   :  { %2603 = vmatpush3.bf16.msra.mxu1 %v2894_v59  ;;  %v274_v59 = vrot.slane %v2946_v56, %v3221_v36 }
  0x94   :  { %2604 = vmatprep.subr.bf16.mxu1 %v2897_v61  ;;  %v2950_v61 = vld [vmem:[#allocation2 + $0x1c] ss:$38 sps:$4 sm:$0xff]  }
  0x95   :  { %2583 = vmatpush3.bf16.msra.mxu0 %v2896_v60  ;;  %v2949_v60 = vld [vmem:[#allocation5 + $0x478] sm:$0xff]  }
  0x96   :  { %2584 = vmatprep.subr.bf16.mxu0 %v2899_v62  ;;  %v2951_v62 = vld [vmem:[#allocation2 + $0x68] ss:$38 sps:$4 sm:$0xff]  }
  0x97   :  { %2605 = vmatpush3.bf16.msra.mxu1 %v2898_v63  ;;  %v283_v63 = vcombine.high %v260_v58, %v274_v59 }
  0x98   :  { %2606 = vmatprep.subr.bf16.mxu1 %v2901_v1  ;;  %v267_v1 = vrot.slane %v2950_v61, %v3221_v36  ;;  %v2982_v61 = vld [vmem:[#allocation7 + $0x8] sm:$0xff]  }
  0x99   :  { %2585 = vmatpush3.bf16.msra.mxu0 %v2900_v0  ;;  %v282_v0 = vcombine.low %v260_v58, %v274_v59 }
  0x9a   :  { %2586 = vmatprep.subr.bf16.mxu0 %v2903_v3  ;;  %v353_v3 = vpack.c.bf16 %v283_v63, %v283_v63  ;;  %v2984_v63 = vld [vmem:[#allocation8 + $0x38] sm:$0xff]  }
  0x9b   :  { %2607 = vmatpush3.bf16.msra.mxu1 %v2902_v2  ;;  %v281_v2 = vrot.slane %v2951_v62, %v3221_v36  ;;  %v2983_v62 = vld [vmem:[#allocation7] sm:$0xff]  }
  0x9c   :  { %2608 = vmatprep.subr.bf16.mxu1 %v2905_v5  ;;  %v2952_v5 = vld [vmem:[#allocation5 + $0x438] sm:$0xff]  }
  0x9d   :  { %2587 = vmatpush3.bf16.msra.mxu0 %v2904_v4  ;;  %v352_v4 = vpack.c.bf16 %v282_v0, %v282_v0  ;;  %v285_v6 = vcombine.high %v267_v1, %v281_v2  ;;  %v284_v7 = vcombine.low %v267_v1, %v281_v2  ;;  %v2985_v0 = vld [vmem:[#allocation8 + $0x30] sm:$0xff]   ;;  %v2986_v1 = vld [vmem:[#allocation8 + $0x28] sm:$0xff]   ;;  %v2987_v2 = vld [vmem:[#allocation8 + $0x20] sm:$0xff]  }
  0x9e   :  { %2616 = vmatprep.subr.bf16.mxu0 %v2911_v11 }
  0x9f   :  { %2609 = vmatpush3.bf16.msra.mxu1 %v2910_v9  ;;  %v3138_v9 = vmov 0.0   ;;  %v355_v10 = vpack.c.bf16 %v285_v6, %v285_v6  ;;  %v354_v11 = vpack.c.bf16 %v284_v7, %v284_v7 }
  0xa0   :  { %2638 = vmatprep.subr.bf16.mxu1 %v2915_v18  ;;  %1739 = vmatmul.mubr.bf16.vlgmr.msra.gmra.mxu0 %v348_v21  ;;  %v2966_v18 = vld [vmem:[#allocation5 + $0x488] sm:$0xff]   ;;  %v2969_v21 = vld [vmem:[#allocation5 + $0x480] sm:$0xff]  }
  0xa1   :  { %2617 = vmatpush3.bf16.msra.mxu0 %v2914_v19  ;;  %1818 = vmatprep.mubr.bf16.mxu0 %v353_v3  ;;  %v2959_v19 = vld [vmem:[#allocation5 + $0x458] sm:$0xff]  }
  0xa2   :  { %1779 = vmatmul.mubr.bf16.vlgmr.msra.gmra.mxu1 %v350_v27  ;;  %2618 = vmatprep.subr.bf16.mxu0 %v2917_v25  ;;  %v2962_v25 = vld [vmem:[#allocation5 + $0x410] sm:$0xff]   ;;  %v2975_v27 = vld [vmem:[#allocation2 + $0x70] ss:$38 sps:$4 sm:$0x33]  }
  0xa3   :  { %2639 = vmatpush3.bf16.msra.mxu1 %v2916_v24  ;;  %1858 = vmatprep.mubr.bf16.mxu1 %v355_v10  ;;  %v2972_v24 = vld [vmem:[#allocation2 + $0x24] ss:$38 sps:$4 sm:$0x33]  }
  0xa4   :  { %2640 = vmatprep.subr.bf16.mxu1 %v2919_v29  ;;  %v296_v29 = vrot.slane %v2970_v23, %v3221_v36  ;;  %v2989_v10 = vld [vmem:[#allocation8 + $0x10] sm:$0xff]  }
  0xa5   :  { %2619 = vmatpush3.bf16.msra.mxu0 %v2918_v28  ;;  %v2964_v28 = vld [vmem:[#allocation5 + $0x448] sm:$0xff]  }
  0xa6   :  { %2620 = vmatprep.subr.bf16.mxu0 %v2921_v31  ;;  %v310_v31 = vrot.slane %v2973_v26, %v3221_v36 }
  0xa7   :  { %2641 = vmatpush3.bf16.msra.mxu1 %v2920_v30  ;;  %v303_v30 = vrot.slane %v2972_v24, %v3221_v36 }
  0xa8   :  { %2642 = vmatprep.subr.bf16.mxu1 %v2923_v33  ;;  %v2965_v33 = vld [vmem:[#allocation5 + $0x408] sm:$0xff]  }
  0xa9   :  { %2621 = vmatpush3.bf16.msra.mxu0 %v2922_v32  ;;  %v317_v32 = vrot.slane %v2975_v27, %v3221_v36 }
  0xaa   :  { %2622 = vmatprep.subr.bf16.mxu0 %v2925_v35 }
  0xab   :  { %2643 = vmatpush3.bf16.msra.mxu1 %v2924_v34  ;;  %v319_v34 = vcombine.high %v296_v29, %v310_v31  ;;  %v320_v35 = vcombine.low %v303_v30, %v317_v32 }
  0xac   :  { %2644 = vmatprep.subr.bf16.mxu1 %v2927_v38 }
  0xad   :  { %2623 = vmatpush3.bf16.msra.mxu0 %v2926_v37  ;;  %v2967_v37 = vld [vmem:[#allocation5 + $0x440] sm:$0xff]   ;;  %v357_v38 = vpack.c.bf16 %v319_v34, %v319_v34 }
  0xae   :  { %2624 = vmatprep.subr.bf16.mxu0 %v2929_v40  ;;  %v2968_v40 = vld [vmem:[#allocation5 + $0x400] sm:$0xff]  }
  0xaf   :  { %2645 = vmatpush3.bf16.msra.mxu1 %v2928_v39  ;;  %v358_v39 = vpack.c.bf16 %v320_v35, %v320_v35 }
  0xb0   :  { %2646 = vmatprep.subr.bf16.mxu1 %v2931_v42  ;;  %v2976_v42 = vld [vmem:[#allocation7 + $0x38] sm:$0xff]  }
  0xb1   :  { %2625 = vmatpush3.bf16.msra.mxu0 %v2930_v41  ;;  %v318_v41 = vcombine.low %v296_v29, %v310_v31 }
  0xb2   :  { %2626 = vmatprep.subr.bf16.mxu0 %v2933_v44  ;;  %v2978_v44 = vld [vmem:[#allocation7 + $0x28] sm:$0xff]  }
  0xb3   :  { %2647 = vmatpush3.bf16.msra.mxu1 %v2932_v43  ;;  %v356_v36 = vpack.c.bf16 %v318_v41, %v318_v41  ;;  %v2977_v43 = vld [vmem:[#allocation7 + $0x30] sm:$0xff]  }
  0xb4   :  { %2648 = vmatprep.subr.bf16.mxu1 %v2935_v46  ;;  %v2980_v46 = vld [vmem:[#allocation7 + $0x18] sm:$0xff]  }
  0xb5   :  { %2627 = vmatpush3.bf16.msra.mxu0 %v2934_v45  ;;  %v2979_v45 = vld [vmem:[#allocation7 + $0x20] sm:$0xff]  }
  0xb6   :  { %2628 = vmatprep.subr.bf16.mxu0 %v2937_v48  ;;  %v2308_v48 = vld [vmem:[%s3296_s2] ss:$0 sm:$0xff] }
  0xb7   :  { %2649 = vmatpush3.bf16.msra.mxu1 %v2936_v47 }
  0xb8   :  { %2650 = vmatprep.subr.bf16.mxu1 %v2939_v50 }
  0xb9   :  { %2629 = vmatpush3.bf16.msra.mxu0 %v2938_v49 }
  0xba   :  { %2630 = vmatprep.subr.bf16.mxu0 %v2941_v52 }
  0xbb   :  { %2651 = vmatpush3.bf16.msra.mxu1 %v2940_v51 }
  0xbc   :  { %2652 = vmatprep.subr.bf16.mxu1 %v2943_v54 }
  0xbd   :  { %2631 = vmatpush3.bf16.msra.mxu0 %v2942_v53 }
  0xbe   :  { %2660 = vmatprep.subr.bf16.mxu0 %v2949_v60  ;;  %v2981_v60 = vld [vmem:[#allocation7 + $0x10] sm:$0xff]  }
  0xbf   :  { %2653 = vmatpush3.bf16.msra.mxu1 %v2948_v57 }
  0xc0   :  { %2713 = vmatprep.subr.bf16.mxu1 %v3138_v9  ;;  %1819 = vmatmul.mubr.bf16.vlgmr.msra.gmra.mxu0 %v352_v4  ;;  %v2988_v4 = vld [vmem:[#allocation8 + $0x18] sm:$0xff]  }
  0xc1   :  { %2661 = vmatpush3.bf16.msra.mxu0 %v2952_v5  ;;  %1898 = vmatprep.mubr.bf16.mxu0 %v357_v38 }
  0xc2   :  { %2662 = vmatprep.subr.bf16.mxu0 %v2953_v8  ;;  %1859 = vmatmul.mubr.bf16.vlgmr.msra.gmra.mxu1 %v354_v11 }
  0xc3   :  { %2719 = vmatprep.mubr.msk.bf16.mxu1 %vm3139_vm0, %v3138_v9  ;;  %2714 = vmatpush3.bf16.msra.mxu1 %v2963_v16 }
  0xc4   :  { %2715 = vmatprep.subr.bf16.mxu1 %v3138_v9 }
  0xc5   :  { %2663 = vmatpush3.bf16.msra.mxu0 %v2954_v12 }
  0xc6   :  { %2664 = vmatprep.subr.bf16.mxu0 %v2955_v13 }
  0xc7   :  { %2716 = vmatpush3.bf16.msra.mxu1 %v2966_v18 }
  0xc8   :  { %2717 = vmatprep.subr.bf16.mxu1 %v3138_v9 }
  0xc9   :  { %2665 = vmatpush3.bf16.msra.mxu0 %v2956_v14 }
  0xca   :  { %2666 = vmatprep.subr.bf16.mxu0 %v2957_v15 }
  0xcb   :  { %2718 = vmatpush3.bf16.msra.mxu1 %v2969_v21 }
  0xcc   :  { %2723 = vmatprep.subr.bf16.mxu1 %v3138_v9 }
  0xcd   :  { %2667 = vmatpush3.bf16.msra.mxu0 %v2958_v17 }
  0xce   :  { %2668 = vmatprep.subr.bf16.mxu0 %v2959_v19  ;;  %2720 = vmatmul.mubr.msk.bf16.vlgmr.msra.gmra.mxu1 %vm1542_vm1, %v358_v39 }
  0xcf   :  { %2739 = vmatprep.mubr.msk.bf16.mxu1 %vm3139_vm0, %v3138_v9  ;;  %2724 = vmatpush3.bf16.msra.mxu1 %v2976_v42 }
  0xd0   :  { %2725 = vmatprep.subr.bf16.mxu1 %v3138_v9 }
  0xd1   :  { %2669 = vmatpush3.bf16.msra.mxu0 %v2960_v20 }
  0xd2   :  { %2670 = vmatprep.subr.bf16.mxu0 %v2961_v22 }
  0xd3   :  { %2726 = vmatpush3.bf16.msra.mxu1 %v2977_v43 }
  0xd4   :  { %2727 = vmatprep.subr.bf16.mxu1 %v3138_v9 }
  0xd5   :  { %2671 = vmatpush3.bf16.msra.mxu0 %v2962_v25 }
  0xd6   :  { %2672 = vmatprep.subr.bf16.mxu0 %v2964_v28 }
  0xd7   :  { %2728 = vmatpush3.bf16.msra.mxu1 %v2978_v44 }
  0xd8   :  { %2729 = vmatprep.subr.bf16.mxu1 %v3138_v9 }
  0xd9   :  { %2673 = vmatpush3.bf16.msra.mxu0 %v2965_v33 }
  0xda   :  { %2674 = vmatprep.subr.bf16.mxu0 %v2967_v37 }
  0xdb   :  { %2730 = vmatpush3.bf16.msra.mxu1 %v2979_v45 }
  0xdc   :  { %2731 = vmatprep.subr.bf16.mxu1 %v3138_v9 }
  0xdd   :  { %2675 = vmatpush3.bf16.msra.mxu0 %v2968_v40 }
  0xde   :  { %2743 = vmatprep.subr.bf16.mxu0 %v3138_v9 }
  0xdf   :  { %2732 = vmatpush3.bf16.msra.mxu1 %v2980_v46 }
  0xe0   :  { %1899 = vmatmul.mubr.bf16.vlgmr.msra.gmra.mxu0 %v356_v36  ;;  %2733 = vmatprep.subr.bf16.mxu1 %v3138_v9 }
  0xe1   :  { %2759 = vmatprep.mubr.msk.bf16.mxu0 %vm3139_vm0, %v3138_v9  ;;  %2744 = vmatpush3.bf16.msra.mxu0 %v2984_v63  ;;  %v2457_v63 = vld [vmem:[%s3298_s4] ss:$0 sm:$0xff]  ;;  %s3140_s4 = smov 112  }
  0xe2   :  { %2745 = vmatprep.subr.bf16.mxu0 %v3138_v9 }
  0xe3   :  { %2734 = vmatpush3.bf16.msra.mxu1 %v2981_v60  ;;  %v2995_v60 = vld [vmem:[#allocation10 + $0x20] sm:$0xff]  }
  0xe4   :  { %2735 = vmatprep.subr.bf16.mxu1 %v3138_v9 }
  0xe5   :  { %2746 = vmatpush3.bf16.msra.mxu0 %v2985_v0 }
  0xe6   :  { %2747 = vmatprep.subr.bf16.mxu0 %v3138_v9 }
  0xe7   :  { %2736 = vmatpush3.bf16.msra.mxu1 %v2982_v61  ;;  %v2996_v61 = vld [vmem:[#allocation10 + $0x18] sm:$0xff]  }
  0xe8   :  { %2737 = vmatprep.subr.bf16.mxu1 %v3138_v9 }
  0xe9   :  { %2748 = vmatpush3.bf16.msra.mxu0 %v2986_v1 }
  0xea   :  { %2749 = vmatprep.subr.bf16.mxu0 %v3138_v9 }
  0xeb   :  { %2738 = vmatpush3.bf16.msra.mxu1 %v2983_v62  ;;  %v2997_v62 = vld [vmem:[#allocation10 + $0x10] sm:$0xff]  }
  0xec   :  { %2763 = vmatprep.subr.bf16.mxu1 %v3138_v9 }
  0xed   :  { %2750 = vmatpush3.bf16.msra.mxu0 %v2987_v2 }
  0xee   :  { %2751 = vmatprep.subr.bf16.mxu0 %v3138_v9 }
  0xf1   :  { %2752 = vmatpush3.bf16.msra.mxu0 %v2988_v4 }
  0xf2   :  { %2753 = vmatprep.subr.bf16.mxu0 %v3138_v9 }
  0xf5   :  { %2754 = vmatpush3.bf16.msra.mxu0 %v2989_v10  ;;  %v2466_v10 = vld [vmem:[%s3300_s6] ss:$0 sm:$0xff] }
  0xf6   :  { %2755 = vmatprep.subr.bf16.mxu0 %v3138_v9 }
 0x120   :  { %v2500_v47 = vpop.f32.mrf.mxu0 }
 0x122   :  { %v2501_v49 = vpop.f32.mrf.mxu0  ;;  %v2522_v51 = vpop.f32.mrf.mxu1 }
 0x123   :  { %v2502_v50 = vadd.f32 %v2501_v49, %v2500_v47 }
 0x124   :  { %v2503_v52 = vpop.f32.mrf.mxu0  ;;  %v2523_v54 = vpop.f32.mrf.mxu1 }
 0x125   :  { %v1581_v53 = vadd.f32 %v2502_v50, %v2308_v48  ;;  %v2524_v55 = vadd.f32 %v2523_v54, %v2522_v51 }
 0x126   :  { %v2504_v56 = vpop.f32.mrf.mxu0  ;;  %v2525_v57 = vpop.f32.mrf.mxu1 }
 0x127   :  { %v1621_v58 = vadd.f32 %v2524_v55, %v1581_v53  ;;  %v2990_v55 = vld [vmem:[#allocation8 + $0x8] sm:$0xff]   ;;  %v2991_v56 = vld [vmem:[#allocation8] sm:$0xff]   ;;  %v2992_v57 = vld [vmem:[#allocation10 + $0x38] sm:$0xff]  }
 0x128   :  { %v2526_v59 = vpop.f32.mrf.mxu1  ;;  %2756 = vmatpush3.bf16.msra.mxu0 %v2990_v55 }
 0x129   :  { %2757 = vmatprep.subr.bf16.mxu0 %v3138_v9  ;;  %v2994_v59 = vld [vmem:[#allocation10 + $0x28] sm:$0xff]  }
 0x12c   :  { %2758 = vmatpush3.bf16.msra.mxu0 %v2991_v56 }
 0x140   :  { %v2544_v3 = vpop.f32.mrf.mxu0 }
 0x142   :  { %v2545_v5 = vpop.f32.mrf.mxu0  ;;  %v2566_v7 = vpop.f32.mrf.mxu1 }
 0x143   :  { %v2546_v6 = vadd.f32 %v2545_v5, %v2544_v3 }
 0x144   :  { %v2547_v8 = vpop.f32.mrf.mxu0  ;;  %v2567_v12 = vpop.f32.mrf.mxu1 }
 0x145   :  { %v1661_v11 = vadd.f32 %v2546_v6, %v1621_v58  ;;  %v2568_v13 = vadd.f32 %v2567_v12, %v2566_v7  ;;  %v2993_v58 = vld [vmem:[#allocation10 + $0x30] sm:$0xff]   ;;  %v2998_v7 = vld [vmem:[#allocation10 + $0x8] sm:$0xff]   ;;  %v2999_v8 = vld [vmem:[#allocation10] sm:$0xff]  }
 0x146   :  { %v2548_v14 = vpop.f32.mrf.mxu0  ;;  %v2569_v15 = vpop.f32.mrf.mxu1 }
 0x147   :  { %v1701_v16 = vadd.f32 %v2568_v13, %v1661_v11 }
 0x148   :  { %v2570_v17 = vpop.f32.mrf.mxu1 }
 0x160   :  { %v2588_v18 = vpop.f32.mrf.mxu0 }
 0x162   :  { %v2589_v19 = vpop.f32.mrf.mxu0  ;;  %v2610_v20 = vpop.f32.mrf.mxu1 }
 0x163   :  { %v2590_v34 = vadd.f32 %v2589_v19, %v2588_v18 }
 0x164   :  { %v2591_v21 = vpop.f32.mrf.mxu0  ;;  %v2611_v22 = vpop.f32.mrf.mxu1 }
 0x165   :  { %v1741_v37 = vadd.f32 %v2590_v34, %v1701_v16  ;;  %v2612_v38 = vadd.f32 %v2611_v22, %v2610_v20 }
 0x166   :  { %v2592_v23 = vpop.f32.mrf.mxu0  ;;  %v2613_v24 = vpop.f32.mrf.mxu1 }
 0x167   :  { %v1781_v36 = vadd.f32 %v2612_v38, %v1741_v37 }
 0x168   :  { %v2614_v25 = vpop.f32.mrf.mxu1 }
 0x180   :  { %v2632_v26 = vpop.f32.mrf.mxu0 }
 0x182   :  { %v2633_v27 = vpop.f32.mrf.mxu0  ;;  %v2654_v28 = vpop.f32.mrf.mxu1 }
 0x183   :  { %v2634_v40 = vadd.f32 %v2633_v27, %v2632_v26 }
 0x184   :  { %v2635_v29 = vpop.f32.mrf.mxu0  ;;  %v2655_v30 = vpop.f32.mrf.mxu1 }
 0x185   :  { %v1821_v43 = vadd.f32 %v2634_v40, %v1781_v36  ;;  %v2656_v44 = vadd.f32 %v2655_v30, %v2654_v28 }
 0x186   :  { %v2636_v31 = vpop.f32.mrf.mxu0  ;;  %v2657_v32 = vpop.f32.mrf.mxu1 }
 0x187   :  { %v1861_v47 = vadd.f32 %v2656_v44, %v1821_v43 }
 0x188   :  { %v2658_v33 = vpop.f32.mrf.mxu1 }
 0x18e   :  { %v1940_v35 = vpop.f32.mrf.mxu1 }
 0x190   :  { %v2721_v39 = vpop.f32.mrf.mxu1 }
 0x192   :  { %v1943_v41 = vpop.f32.mrf.mxu1 }
 0x194   :  { %v2722_v42 = vpop.f32.mrf.mxu1 }
 0x1a0   :  { %v2676_v45 = vpop.f32.mrf.mxu0 }
 0x1a2   :  { %v2677_v46 = vpop.f32.mrf.mxu0 }
 0x1a3   :  { %v2678_v48 = vadd.f32 %v2677_v46, %v2676_v45 }
 0x1a4   :  { %v2679_v49 = vpop.f32.mrf.mxu0 }
 0x1a5   :  { %v1901_v50 = vadd.f32 %v2678_v48, %v1861_v47 }
 0x1a6   :  { %v2680_v51 = vpop.f32.mrf.mxu0 }
 0x1a7   :  { %v1941_v52 = vadd.f32 %v1940_v35, %v1901_v50 }
 0x1a9   :  { %v1946_v53 = vmax.f32 %v1941_v52, 0.0 }
 0x1ab   :  { %v1947_v54 = vpack.c.bf16 %v1946_v53, %v1946_v53 }
 0x1ad   :  { %2740 = vmatmul.mubr.bf16.vlgmr.msra.gmra.mxu1 %v1947_v54 }
 0x1ae   :  { %2779 = vmatprep.mubr.msk.bf16.mxu1 %vm3139_vm0, %v3138_v9  ;;  %2764 = vmatpush3.bf16.msra.mxu1 %v2992_v57 }
 0x1af   :  { %2765 = vmatprep.subr.bf16.mxu1 %v3138_v9 }
 0x1b2   :  { %2766 = vmatpush3.bf16.msra.mxu1 %v2993_v58 }
 0x1b3   :  { %2767 = vmatprep.subr.bf16.mxu1 %v3138_v9 }
 0x1b6   :  { %2768 = vmatpush3.bf16.msra.mxu1 %v2994_v59 }
 0x1b7   :  { %2769 = vmatprep.subr.bf16.mxu1 %v3138_v9 }
 0x1ba   :  { %2770 = vmatpush3.bf16.msra.mxu1 %v2995_v60 }
 0x1bb   :  { %2771 = vmatprep.subr.bf16.mxu1 %v3138_v9 }
 0x1be   :  { %2772 = vmatpush3.bf16.msra.mxu1 %v2996_v61 }
 0x1bf   :  { %2773 = vmatprep.subr.bf16.mxu1 %v3138_v9 }
 0x1c2   :  { %2774 = vmatpush3.bf16.msra.mxu1 %v2997_v62 }
 0x1c3   :  { %2775 = vmatprep.subr.bf16.mxu1 %v3138_v9 }
 0x1c6   :  { %2776 = vmatpush3.bf16.msra.mxu1 %v2998_v7 }
 0x1c7   :  { %2777 = vmatprep.subr.bf16.mxu1 %v3138_v9  ;;  %v2475_v9 = vld [vmem:[%s3302_s8] ss:$0 sm:$0xff] }
 0x1ca   :  { %2778 = vmatpush3.bf16.msra.mxu1 %v2999_v8 }
 0x26d   :  { %v2053_v0 = vpop.f32.mrf.mxu1 }
 0x26e   :  { %v2054_v1 = vadd.f32 %v2457_v63, %v2053_v0 }
 0x26f   :  { %v2741_v2 = vpop.f32.mrf.mxu1 }
 0x270   :  { %v2059_v3 = vmax.f32 %v2054_v1, 0.0 }
 0x271   :  { %v2056_v4 = vpop.f32.mrf.mxu1 }
 0x272   :  { %v2060_v5 = vpack.c.bf16 %v2059_v3, %v2059_v3 }
 0x273   :  { %v2742_v6 = vpop.f32.mrf.mxu1 }
 0x274   :  { %2760 = vmatmul.mubr.bf16.vlgmr.msra.gmra.mxu0 %v2060_v5 }
 0x334   :  { %v2166_v11 = vpop.f32.mrf.mxu0 }
 0x335   :  { %v2167_v12 = vadd.f32 %v2466_v10, %v2166_v11 }
 0x336   :  { %v2761_v13 = vpop.f32.mrf.mxu0 }
 0x337   :  { %v2172_v14 = vmax.f32 %v2167_v12, 0.0 }
 0x338   :  { %v2169_v15 = vpop.f32.mrf.mxu0 }
 0x339   :  { %v2173_v16 = vpack.c.bf16 %v2172_v14, %v2172_v14  ;;  %2285 = vrot.lane.b32.xlu0 %v2172_v14, %s3140_s4 }
 0x33a   :  { %v2762_v17 = vpop.f32.mrf.mxu0 }
 0x33b   :  { %2780 = vmatmul.mubr.bf16.vlgmr.msra.gmra.mxu1 %v2173_v16 }
 0x3ab   :  { %v2286_v20 = vpop.permute.xlu0 %2285 }
 0x3fb   :  { %v2279_v18 = vpop.f32.mrf.mxu1 }
 0x3fc   :  { %v2280_v19 = vadd.f32 %v2475_v9, %v2279_v18 }
 0x3fd   :  { %v2781_v21 = vpop.f32.mrf.mxu1 }
 0x3fe   :  { %v2287_v22 = vadd.f32 %v2286_v20, %v2280_v19 }
 0x3ff   :  { %v2282_v23 = vpop.f32.mrf.mxu1 }
 0x400   :  { %2288 = vst [vmem:[#allocation11] sm:$0xff] %v2287_v22 }
 0x401   :  { %v2782_v24 = vpop.f32.mrf.mxu1 }
 0x402   :  { %2293 = vsyncadd [#allocation4], 96  ;;  %s3141_s6 = smov [#allocation11]  }
 0x403   :  { %s2294_s20 = sshll.u32 %s3141_s6, 4  ;;  %s2295_s20 = int_to_ptr.vmem [resolvable:$true] %s2294_s20 }
 0x404   :  { %s3100_s21 = scalar_lea.vmem %s2295_s20, 32  ;;  %s3104_s22 = scalar_lea.vmem %s2295_s20, 128 }
 0x405   :  { %p3101_p11 = scmp.ne.s32.totalorder %s2295_s20, %s3100_s21  ;;  %p3105_p12 = scmp.lt.s32.totalorder %s2295_s20, %s2295_s20 }
 0x406   :  { %p3106_p13 = scmp.lt.s32.totalorder %s3104_s22, %s3100_s21 }
 0x408   :  { %p3107_p0 = por %p3106_p13, %p3105_p12 }
 0x40a   :  { %p3108_p1 = pnand %p3107_p0, %p3101_p11 }
 0x40c   :  { %3111 = shalt.err (!%p3108_p1)
}
 0x40d   :  { %s3142_s8 = smov 32   ;;  %s3143_s1 = smov 2  }
 0x40e   :  { %2300 = dma.vmem_to_hbm [thread:$0]  %s2295_s20, 32, %s3303_s9, [#allocation4], %s3142_s8, %s3142_s8, %s3143_s1  }
 0x40f   :  { %3126 = dma.done.wait [#allocation4], 128  }
 0x410   :  { %3127 = vsyncadd [#allocation4], 4294967168 }
 0x411   :  { %2304 = vsyncpa [#allocation3], 1 }
 0x412   :  { %2305 = vsyncpa [#allocation6], 1 }
 0x413   :  { %2306 = vsyncpa [#allocation9], 1 }
 0x414   :  { %2307 = vsyncpa [#allocation4], 1 }

// kernel: tpu_custom_call.1
= control target key start
LH: loop header
LB: loop body
LE: loop exit
PB: predicated region body
PF: predicated region fallthrough
CT: control target
= control target key end

     0   :  { %14 = vsyncpa [#allocation3], 0  ;;  %s3294_s0 = inlined_call_operand.hbm [shape: f32[2,2352], index: 0, kind: input, shape index: {}]   ;;  %s3295_s1 = inlined_call_operand.hbm [shape: bf16[2352,128], index: 1, kind: input, shape index: {}]   ;;  %s3296_s2 = inlined_call_operand.vmem [shape: f32[1,128], index: 2, kind: input, shape index: {}]   ;;  %s3297_s3 = inlined_call_operand.hbm [shape: bf16[128,128], index: 3, kind: input, shape index: {}]   ;;  %s3298_s4 = inlined_call_operand.vmem [shape: f32[1,128], index: 4, kind: input, shape index: {}]   ;;  %s3299_s5 = inlined_call_operand.hbm [shape: bf16[128,128], index: 5, kind: input, shape index: {}]   ;;  %s3300_s6 = inlined_call_operand.vmem [shape: f32[1,128], index: 6, kind: input, shape index: {}]   ;;  %s3301_s7 = inlined_call_operand.hbm [shape: bf16[128,128], index: 7, kind: input, shape index: {}]   ;;  %s3302_s8 = inlined_call_operand.vmem [shape: f32[1,128], index: 8, kind: input, shape index: {}]   ;;  %s3303_s9 = inlined_call_operand.hbm [shape: f32[2,128], index: 9, kind: output, shape index: {}]  }
   0x1   :  { %15 = vsyncpa [#allocation6], 0 }
   0x2   :  { %16 = vsyncpa [#allocation9], 0 }
   0x3   :  { %17 = vsyncpa [#allocation4], 0 }
   0x4   :  { %22 = vsyncadd [#allocation3], 1824  ;;  %s3128_s30 = smov [#allocation5]  }
   0x5   :  { %s35_s10 = sshll.u32 %s3128_s30, 4  ;;  %s36_s10 = int_to_ptr.vmem [resolvable:$true] %s35_s10 }
   0x6   :  { %s3008_s11 = scalar_lea.vmem %s36_s10, 18816  ;;  %p3013_p1 = scmp.lt.s32.totalorder %s36_s10, %s36_s10 }
   0x7   :  { %p3009_p0 = scmp.ne.s32.totalorder %s36_s10, %s3008_s11  ;;  %p3014_p2 = scmp.lt.s32.totalorder %s3008_s11, %s3008_s11 }
   0x9   :  { %p3015_p3 = por %p3014_p2, %p3013_p1 }
   0xb   :  { %p3016_p4 = pnand %p3015_p3, %p3009_p0 }
   0xd   :  { %3019 = shalt.err (!%p3016_p4)
}
   0xe   :  { %s3129_s12 = smov 64   ;;  %s3130_s13 = smov 4  }
   0xf   :  { %41 = dma.hbm_to_vmem [thread:$0]  %s3295_s1, 18816, %s36_s10, [#allocation6], %s3129_s12, %s3129_s12, %s3130_s13  }
  0x10   :  { %s3131_s16 = smov [#allocation8]   ;;  %s3132_s18 = smov [#allocation2]  }
  0x11   :  { %s63_s17 = sshll.u32 %s3131_s16, 4  ;;  %s23_s19 = sshll.u32 %s3132_s18, 4  ;;  %s64_s17 = int_to_ptr.vmem [resolvable:$true] %s63_s17  ;;  %s24_s19 = int_to_ptr.vmem [resolvable:$true] %s23_s19 }
  0x12   :  { %s3028_s20 = scalar_lea.vmem %s64_s17, 1024  ;;  %p3033_p6 = scmp.lt.s32.totalorder %s64_s17, %s64_s17 }
  0x13   :  { %p3029_p5 = scmp.ne.s32.totalorder %s64_s17, %s3028_s20  ;;  %p3034_p7 = scmp.lt.s32.totalorder %s3028_s20, %s3028_s20 }
  0x15   :  { %p3035_p8 = por %p3034_p7, %p3033_p6 }
  0x17   :  { %p3036_p9 = pnand %p3035_p8, %p3029_p5 }
  0x19   :  { %3039 = shalt.err (!%p3036_p9)
}
  0x1a   :  { %69 = dma.hbm_to_vmem [thread:$0]  %s3299_s5, 1024, %s64_s17, [#allocation9], %s3129_s12, %s3129_s12, %s3130_s13  }
  0x1b   :  { %s3048_s1 = scalar_lea.vmem %s24_s19, 608  ;;  %s3052_s23 = scalar_lea.vmem %s24_s19, 2432 }
  0x1c   :  { %p3049_p10 = scmp.ne.s32.totalorder %s24_s19, %s3048_s1  ;;  %p3053_p11 = scmp.lt.s32.totalorder %s24_s19, %s24_s19 }
  0x1d   :  { %p3054_p12 = scmp.lt.s32.totalorder %s3052_s23, %s3048_s1 }
  0x1f   :  { %p3055_p13 = por %p3054_p12, %p3053_p11 }
  0x21   :  { %p3056_p0 = pnand %p3055_p13, %p3049_p10 }
  0x23   :  { %3059 = shalt.err (!%p3056_p0)
}
  0x24   :  { %s3133_s24 = smov 608   ;;  %s3134_s25 = smov 38  }
  0x25   :  { %29 = dma.hbm_to_vmem [thread:$0]  %s3294_s0, 608, %s24_s19, [#allocation3], %s3133_s24, %s3133_s24, %s3134_s25  }
  0x26   :  { %s3135_s28 = smov [#allocation7]   ;;  %s3136_s30 = smov [#allocation10]  }
  0x27   :  { %s49_s29 = sshll.u32 %s3135_s28, 4  ;;  %s77_s5 = sshll.u32 %s3136_s30, 4  ;;  %s50_s29 = int_to_ptr.vmem [resolvable:$true] %s49_s29  ;;  %s78_s5 = int_to_ptr.vmem [resolvable:$true] %s77_s5 }
  0x28   :  { %s3068_s10 = scalar_lea.vmem %s50_s29, 1024  ;;  %p3073_p2 = scmp.lt.s32.totalorder %s50_s29, %s50_s29 }
  0x29   :  { %p3069_p1 = scmp.ne.s32.totalorder %s50_s29, %s3068_s10  ;;  %p3074_p3 = scmp.lt.s32.totalorder %s3068_s10, %s3068_s10 }
  0x2b   :  { %p3075_p4 = por %p3074_p3, %p3073_p2 }
  0x2d   :  { %p3076_p5 = pnand %p3075_p4, %p3069_p1 }
  0x2f   :  { %3079 = shalt.err (!%p3076_p5)
}
  0x30   :  { %55 = dma.hbm_to_vmem [thread:$0]  %s3297_s3, 1024, %s50_s29, [#allocation6], %s3129_s12, %s3129_s12, %s3130_s13  }
  0x31   :  { %s3088_s0 = scalar_lea.vmem %s78_s5, 1024  ;;  %p3093_p7 = scmp.lt.s32.totalorder %s78_s5, %s78_s5 }
  0x32   :  { %p3089_p6 = scmp.ne.s32.totalorder %s78_s5, %s3088_s0  ;;  %p3094_p8 = scmp.lt.s32.totalorder %s3088_s0, %s3088_s0 }
  0x34   :  { %p3095_p9 = por %p3094_p8, %p3093_p7 }
  0x36   :  { %p3096_p10 = pnand %p3095_p9, %p3089_p6 }
  0x38   :  { %3099 = shalt.err (!%p3096_p10)
}
  0x39   :  { %83 = dma.hbm_to_vmem [thread:$0]  %s3301_s7, 1024, %s78_s5, [#allocation9], %s3129_s12, %s3129_s12, %s3130_s13  }
  0x3a   :  { %3120 = dma.done.wait [#allocation3], 2432  }
  0x3b   :  { %3121 = vsyncadd [#allocation3], 4294964864 }
  0x3c   :  { %3122 = dma.done.wait [#allocation6], 19840  }
  0x3d   :  { %3123 = vsyncadd [#allocation6], 4294947456 }
  0x3e   :  { %3124 = dma.done.wait [#allocation9], 2048  }
  0x3f   :  { %3125 = vsyncadd [#allocation9], 4294965248  ;;  %v2799_v0 = vld [vmem:[#allocation5 + $0x78] sm:$0xff]   ;;  %v2803_v4 = vld [vmem:[#allocation5 + $0x70] sm:$0xff]   ;;  %v3137_v23 = vmov 1983009808   ;;  %v149_v25 = vlaneseq }
  0x40   :  { %v2800_v1 = vld [vmem:[#allocation5 + $0x38] sm:$0xff]   ;;  %2484 = vmatprep.subr.bf16.mxu0 %v2799_v0  ;;  %v2804_v5 = vld [vmem:[#allocation5 + $0x30] sm:$0xff]   ;;  %v2807_v8 = vld [vmem:[#allocation5 + $0x68] sm:$0xff]   ;;  %v147_v24 = vunpack.c.l.s4 %v3137_v23  ;;  %vm3139_vm0 = vmmov 0   ;;  %vm1542_vm1 = vcmask 392192  }
  0x41   :  { %v2801_v2 = vld [vmem:[#allocation5 + $0xf8] sm:$0xff]   ;;  %2485 = vmatpush3.bf16.msra.mxu0 %v2800_v1  ;;  %v2805_v6 = vld [vmem:[#allocation5 + $0xf0] sm:$0xff]   ;;  %v2808_v9 = vld [vmem:[#allocation5 + $0x28] sm:$0xff]   ;;  %v150_v31 = vshrl.u32 %v149_v25, 7 }
  0x42   :  { %v2802_v3 = vld [vmem:[#allocation5 + $0xb8] sm:$0xff]   ;;  %2506 = vmatprep.subr.bf16.mxu1 %v2801_v2  ;;  %2486 = vmatprep.subr.bf16.mxu0 %v2803_v4  ;;  %v2806_v7 = vld [vmem:[#allocation5 + $0xb0] sm:$0xff]   ;;  %v2809_v10 = vld [vmem:[#allocation5 + $0xe8] sm:$0xff]   ;;  %v148_v30 = vunpack.c.0.s8 %v147_v24 }
  0x43   :  { %2507 = vmatpush3.bf16.msra.mxu1 %v2802_v3  ;;  %v2810_v11 = vld [vmem:[#allocation5 + $0xa8] sm:$0xff]   ;;  %v2811_v12 = vld [vmem:[#allocation5 + $0x60] sm:$0xff]   ;;  %v2815_v16 = vld [vmem:[#allocation5 + $0x58] sm:$0xff]  }
  0x44   :  { %2508 = vmatprep.subr.bf16.mxu1 %v2805_v6  ;;  %v2812_v13 = vld [vmem:[#allocation5 + $0x20] sm:$0xff]   ;;  %v2816_v17 = vld [vmem:[#allocation5 + $0x18] sm:$0xff]   ;;  %v2819_v20 = vld [vmem:[#allocation5 + $0x50] sm:$0xff]   ;;  %v3221_v36 = vsub.s32 %v148_v30, %v150_v31 }
  0x45   :  { %2487 = vmatpush3.bf16.msra.mxu0 %v2804_v5  ;;  %v2813_v14 = vld [vmem:[#allocation5 + $0xe0] sm:$0xff]   ;;  %v2817_v18 = vld [vmem:[#allocation5 + $0xd8] sm:$0xff]   ;;  %v2820_v21 = vld [vmem:[#allocation5 + $0x10] sm:$0xff]  }
  0x46   :  { %2488 = vmatprep.subr.bf16.mxu0 %v2807_v8  ;;  %v2814_v15 = vld [vmem:[#allocation5 + $0xa0] sm:$0xff]   ;;  %v2818_v19 = vld [vmem:[#allocation5 + $0x98] sm:$0xff]   ;;  %v2821_v22 = vld [vmem:[#allocation5 + $0xd0] sm:$0xff]  }
  0x47   :  { %2509 = vmatpush3.bf16.msra.mxu1 %v2806_v7  ;;  %v2822_v26 = vld [vmem:[#allocation5 + $0x90] sm:$0xff]   ;;  %v2823_v27 = vld [vmem:[#allocation5 + $0x48] sm:$0xff]   ;;  %v2827_v33 = vld [vmem:[#allocation5 + $0x40] sm:$0xff]  }
  0x48   :  { %2510 = vmatprep.subr.bf16.mxu1 %v2809_v10  ;;  %v2824_v28 = vld [vmem:[#allocation5 + $0x8] sm:$0xff]   ;;  %v2828_v34 = vld [vmem:[#allocation5] sm:$0xff]   ;;  %v2832_v38 = vld [vmem:[#allocation2 + $0x4c] ss:$38 sps:$4 sm:$0xff]  }
  0x49   :  { %2489 = vmatpush3.bf16.msra.mxu0 %v2808_v9  ;;  %v2825_v29 = vld [vmem:[#allocation5 + $0xc8] sm:$0xff]   ;;  %v2829_v35 = vld [vmem:[#allocation5 + $0xc0] sm:$0xff]   ;;  %v166_v41 = vrot.slane %v2832_v38, %v3221_v36  ;;  %v2835_v42 = vld [vmem:[#allocation5 + $0x178] sm:$0xff]  }
  0x4a   :  { %2490 = vmatprep.subr.bf16.mxu0 %v2811_v12  ;;  %v2826_v32 = vld [vmem:[#allocation5 + $0x88] sm:$0xff]   ;;  %v2834_v39 = vld [vmem:[#allocation5 + $0x80] sm:$0xff]   ;;  %v2839_v49 = vld [vmem:[#allocation5 + $0x1f8] sm:$0xff]  }
  0x4b   :  { %2511 = vmatpush3.bf16.msra.mxu1 %v2810_v11  ;;  %v2830_v37 = vld [vmem:[#allocation2] ss:$38 sps:$4 sm:$0xff]   ;;  %v2837_v44 = vld [vmem:[#allocation2 + $0x50] ss:$38 sps:$4 sm:$0xff]  }
  0x4c   :  { %2512 = vmatprep.subr.bf16.mxu1 %v2813_v14  ;;  %v152_v40 = vrot.slane %v2830_v37, %v3221_v36  ;;  %v2836_v43 = vld [vmem:[#allocation2 + $0x4] ss:$38 sps:$4 sm:$0xff]   ;;  %v173_v48 = vrot.slane %v2837_v44, %v3221_v36  ;;  %v2838_v52 = vld [vmem:[#allocation5 + $0x138] sm:$0xff]   ;;  %v2849_v1 = vld [vmem:[#allocation5 + $0x160] sm:$0xff]  }
  0x4d   :  { %2491 = vmatpush3.bf16.msra.mxu0 %v2812_v13  ;;  %v159_v47 = vrot.slane %v2836_v43, %v3221_v36  ;;  %v2841_v55 = vld [vmem:[#allocation5 + $0x170] sm:$0xff]   ;;  %v2840_v56 = vld [vmem:[#allocation5 + $0x1b8] sm:$0xff]   ;;  %v2845_v61 = vld [vmem:[#allocation5 + $0x168] sm:$0xff]  }
  0x4e   :  { %2492 = vmatprep.subr.bf16.mxu0 %v2815_v16  ;;  %v175_v45 = vcombine.high %v152_v40, %v166_v41  ;;  %v174_v46 = vcombine.low %v152_v40, %v166_v41  ;;  %v2842_v59 = vld [vmem:[#allocation5 + $0x130] sm:$0xff]   ;;  %v2846_v63 = vld [vmem:[#allocation5 + $0x128] sm:$0xff]   ;;  %v2850_v3 = vld [vmem:[#allocation5 + $0x120] sm:$0xff]  }
  0x4f   :  { %2513 = vmatpush3.bf16.msra.mxu1 %v2814_v15  ;;  %v177_v53 = vcombine.high %v159_v47, %v173_v48  ;;  %v176_v54 = vcombine.low %v159_v47, %v173_v48  ;;  %v2843_v60 = vld [vmem:[#allocation5 + $0x1f0] sm:$0xff]   ;;  %v2847_v0 = vld [vmem:[#allocation5 + $0x1e8] sm:$0xff]   ;;  %v2851_v4 = vld [vmem:[#allocation5 + $0x1e0] sm:$0xff]  }
  0x50   :  { %2514 = vmatprep.subr.bf16.mxu1 %v2817_v18  ;;  %v341_v50 = vpack.c.bf16 %v175_v45, %v175_v45  ;;  %v340_v51 = vpack.c.bf16 %v174_v46, %v174_v46  ;;  %v2844_v62 = vld [vmem:[#allocation5 + $0x1b0] sm:$0xff]   ;;  %v2848_v2 = vld [vmem:[#allocation5 + $0x1a8] sm:$0xff]   ;;  %v2853_v5 = vld [vmem:[#allocation5 + $0x158] sm:$0xff]  }
  0x51   :  { %2493 = vmatpush3.bf16.msra.mxu0 %v2816_v17  ;;  %v343_v57 = vpack.c.bf16 %v177_v53, %v177_v53  ;;  %v342_v58 = vpack.c.bf16 %v176_v54, %v176_v54  ;;  %v2852_v6 = vld [vmem:[#allocation5 + $0x1a0] sm:$0xff]   ;;  %v2854_v7 = vld [vmem:[#allocation5 + $0x118] sm:$0xff]   ;;  %v2857_v9 = vld [vmem:[#allocation5 + $0x150] sm:$0xff]  }
  0x52   :  { %2494 = vmatprep.subr.bf16.mxu0 %v2819_v20  ;;  %1578 = vmatprep.mubr.bf16.mxu0 %v341_v50  ;;  %v2855_v8 = vld [vmem:[#allocation5 + $0x1d8] sm:$0xff]   ;;  %v2858_v11 = vld [vmem:[#allocation5 + $0x110] sm:$0xff]   ;;  %v2861_v13 = vld [vmem:[#allocation5 + $0x148] sm:$0xff]  }
  0x53   :  { %2515 = vmatpush3.bf16.msra.mxu1 %v2818_v19  ;;  %1618 = vmatprep.mubr.bf16.mxu1 %v343_v57  ;;  %v2856_v10 = vld [vmem:[#allocation5 + $0x198] sm:$0xff]   ;;  %v2859_v12 = vld [vmem:[#allocation5 + $0x1d0] sm:$0xff]   ;;  %v2862_v15 = vld [vmem:[#allocation5 + $0x108] sm:$0xff]  }
  0x54   :  { %2516 = vmatprep.subr.bf16.mxu1 %v2821_v22  ;;  %v2860_v14 = vld [vmem:[#allocation5 + $0x190] sm:$0xff]   ;;  %v2863_v16 = vld [vmem:[#allocation5 + $0x1c8] sm:$0xff]   ;;  %v2865_v18 = vld [vmem:[#allocation5 + $0x140] sm:$0xff]  }
  0x55   :  { %2495 = vmatpush3.bf16.msra.mxu0 %v2820_v21  ;;  %v2864_v17 = vld [vmem:[#allocation5 + $0x188] sm:$0xff]   ;;  %v2866_v19 = vld [vmem:[#allocation5 + $0x100] sm:$0xff]   ;;  %v2868_v21 = vld [vmem:[#allocation2 + $0x8] ss:$38 sps:$4 sm:$0xff]  }
  0x56   :  { %2496 = vmatprep.subr.bf16.mxu0 %v2823_v27  ;;  %v2867_v20 = vld [vmem:[#allocation5 + $0x1c0] sm:$0xff]   ;;  %v188_v24 = vrot.slane %v2868_v21, %v3221_v36  ;;  %v2874_v27 = vld [vmem:[#allocation2 + $0xc] ss:$38 sps:$4 sm:$0xff]   ;;  %v2883_v46 = vld [vmem:[#allocation5 + $0x268] sm:$0xff]  }
  0x57   :  { %2517 = vmatpush3.bf16.msra.mxu1 %v2822_v26  ;;  %v2870_v22 = vld [vmem:[#allocation2 + $0x54] ss:$38 sps:$4 sm:$0xff]   ;;  %v195_v31 = vrot.slane %v2874_v27, %v3221_v36  ;;  %v2879_v40 = vld [vmem:[#allocation5 + $0x270] sm:$0xff]   ;;  %v2884_v48 = vld [vmem:[#allocation5 + $0x228] sm:$0xff]  }
  0x58   :  { %2518 = vmatprep.subr.bf16.mxu1 %v2825_v29  ;;  %v2872_v23 = vld [vmem:[#allocation5 + $0x180] sm:$0xff]   ;;  %v202_v25 = vrot.slane %v2870_v22, %v3221_v36  ;;  %v2873_v26 = vld [vmem:[#allocation5 + $0x278] sm:$0xff]   ;;  %v2880_v44 = vld [vmem:[#allocation5 + $0x230] sm:$0xff]  }
  0x59   :  { %2497 = vmatpush3.bf16.msra.mxu0 %v2824_v28  ;;  %v2875_v28 = vld [vmem:[#allocation2 + $0x58] ss:$38 sps:$4 sm:$0xff]   ;;  %v2876_v37 = vld [vmem:[#allocation5 + $0x238] sm:$0xff]   ;;  %v2881_v45 = vld [vmem:[#allocation5 + $0x2f0] sm:$0xff]  }
  0x5a   :  { %2498 = vmatprep.subr.bf16.mxu0 %v2827_v33  ;;  %v211_v29 = vcombine.high %v188_v24, %v202_v25  ;;  %v210_v30 = vcombine.low %v188_v24, %v202_v25  ;;  %v2877_v33 = vld [vmem:[#allocation5 + $0x2f8] sm:$0xff]   ;;  %v2882_v47 = vld [vmem:[#allocation5 + $0x2b0] sm:$0xff]   ;;  %v2887_v50 = vld [vmem:[#allocation5 + $0x260] sm:$0xff]  }
  0x5b   :  { %2519 = vmatpush3.bf16.msra.mxu1 %v2826_v32  ;;  %v209_v32 = vrot.slane %v2875_v28, %v3221_v36  ;;  %v2878_v41 = vld [vmem:[#allocation5 + $0x2b8] sm:$0xff]   ;;  %v2889_v53 = vld [vmem:[#allocation5 + $0x2e0] sm:$0xff]   ;;  %v2917_v25 = vld [vmem:[#allocation5 + $0x370] sm:$0xff]  }
  0x5c   :  { %2520 = vmatprep.subr.bf16.mxu1 %v2829_v35  ;;  %v344_v35 = vpack.c.bf16 %v210_v30, %v210_v30  ;;  %v2891_v54 = vld [vmem:[#allocation5 + $0x258] sm:$0xff]   ;;  %v2918_v28 = vld [vmem:[#allocation5 + $0x330] sm:$0xff]  }
  0x5d   :  { %2499 = vmatpush3.bf16.msra.mxu0 %v2828_v34  ;;  %v345_v34 = vpack.c.bf16 %v211_v29, %v211_v29  ;;  %v213_v38 = vcombine.high %v195_v31, %v209_v32  ;;  %v2893_v57 = vld [vmem:[#allocation5 + $0x2d8] sm:$0xff]   ;;  %v2919_v29 = vld [vmem:[#allocation5 + $0x3f0] sm:$0xff]  }
  0x5e   :  { %2528 = vmatprep.subr.bf16.mxu0 %v2835_v42  ;;  %v2916_v24 = vld [vmem:[#allocation5 + $0x3b8] sm:$0xff]   ;;  %v2920_v30 = vld [vmem:[#allocation5 + $0x3b0] sm:$0xff]  }
  0x5f   :  { %2521 = vmatpush3.bf16.msra.mxu1 %v2834_v39  ;;  %v212_v39 = vcombine.low %v195_v31, %v209_v32  ;;  %v347_v42 = vpack.c.bf16 %v213_v38, %v213_v38  ;;  %v2921_v31 = vld [vmem:[#allocation5 + $0x368] sm:$0xff]   ;;  %v2927_v38 = vld [vmem:[#allocation5 + $0x3e0] sm:$0xff]  }
  0x60   :  { %2550 = vmatprep.subr.bf16.mxu1 %v2839_v49  ;;  %1579 = vmatmul.mubr.bf16.vlgmr.msra.gmra.mxu0 %v340_v51  ;;  %v2885_v49 = vld [vmem:[#allocation5 + $0x2e8] sm:$0xff]  }
  0x61   :  { %2529 = vmatpush3.bf16.msra.mxu0 %v2838_v52  ;;  %1658 = vmatprep.mubr.bf16.mxu0 %v345_v34  ;;  %v346_v43 = vpack.c.bf16 %v212_v39, %v212_v39  ;;  %v2886_v51 = vld [vmem:[#allocation5 + $0x2a8] sm:$0xff]   ;;  %v2888_v52 = vld [vmem:[#allocation5 + $0x220] sm:$0xff]  }
  0x62   :  { %2530 = vmatprep.subr.bf16.mxu0 %v2841_v55  ;;  %1619 = vmatmul.mubr.bf16.vlgmr.msra.gmra.mxu1 %v342_v58  ;;  %v2890_v55 = vld [vmem:[#allocation5 + $0x2a0] sm:$0xff]   ;;  %v2895_v58 = vld [vmem:[#allocation5 + $0x250] sm:$0xff]   ;;  %v2922_v32 = vld [vmem:[#allocation5 + $0x328] sm:$0xff]  }
  0x63   :  { %2551 = vmatpush3.bf16.msra.mxu1 %v2840_v56  ;;  %1698 = vmatprep.mubr.bf16.mxu1 %v347_v42  ;;  %v2892_v56 = vld [vmem:[#allocation5 + $0x218] sm:$0xff]   ;;  %v2924_v34 = vld [vmem:[#allocation5 + $0x3a8] sm:$0xff]   ;;  %v2928_v39 = vld [vmem:[#allocation5 + $0x3a0] sm:$0xff]  }
  0x64   :  { %2552 = vmatprep.subr.bf16.mxu1 %v2843_v60  ;;  %v2896_v60 = vld [vmem:[#allocation5 + $0x210] sm:$0xff]   ;;  %v2931_v42 = vld [vmem:[#allocation5 + $0x3d8] sm:$0xff]  }
  0x65   :  { %2531 = vmatpush3.bf16.msra.mxu0 %v2842_v59  ;;  %v2894_v59 = vld [vmem:[#allocation5 + $0x298] sm:$0xff]  }
  0x66   :  { %2532 = vmatprep.subr.bf16.mxu0 %v2845_v61  ;;  %v2897_v61 = vld [vmem:[#allocation5 + $0x2d0] sm:$0xff]  }
  0x67   :  { %2553 = vmatpush3.bf16.msra.mxu1 %v2844_v62  ;;  %v2899_v62 = vld [vmem:[#allocation5 + $0x248] sm:$0xff]  }
  0x68   :  { %2554 = vmatprep.subr.bf16.mxu1 %v2847_v0  ;;  %v2900_v0 = vld [vmem:[#allocation5 + $0x208] sm:$0xff]  }
  0x69   :  { %2533 = vmatpush3.bf16.msra.mxu0 %v2846_v63  ;;  %v2898_v63 = vld [vmem:[#allocation5 + $0x290] sm:$0xff]  }
  0x6a   :  { %2534 = vmatprep.subr.bf16.mxu0 %v2849_v1  ;;  %v2901_v1 = vld [vmem:[#allocation5 + $0x2c8] sm:$0xff]  }
  0x6b   :  { %2555 = vmatpush3.bf16.msra.mxu1 %v2848_v2  ;;  %v2902_v2 = vld [vmem:[#allocation5 + $0x288] sm:$0xff]  }
  0x6c   :  { %2556 = vmatprep.subr.bf16.mxu1 %v2851_v4  ;;  %v2904_v4 = vld [vmem:[#allocation5 + $0x200] sm:$0xff]  }
  0x6d   :  { %2535 = vmatpush3.bf16.msra.mxu0 %v2850_v3  ;;  %v2903_v3 = vld [vmem:[#allocation5 + $0x240] sm:$0xff]  }
  0x6e   :  { %2536 = vmatprep.subr.bf16.mxu0 %v2853_v5  ;;  %v2905_v5 = vld [vmem:[#allocation5 + $0x2c0] sm:$0xff]  }
  0x6f   :  { %2557 = vmatpush3.bf16.msra.mxu1 %v2852_v6  ;;  %v2906_v6 = vld [vmem:[#allocation2 + $0x10] ss:$38 sps:$4 sm:$0xff]  }
  0x70   :  { %2558 = vmatprep.subr.bf16.mxu1 %v2855_v8  ;;  %v224_v8 = vrot.slane %v2906_v6, %v3221_v36 }
  0x71   :  { %2537 = vmatpush3.bf16.msra.mxu0 %v2854_v7  ;;  %v2908_v7 = vld [vmem:[#allocation2 + $0x5c] ss:$38 sps:$4 sm:$0xff]  }
  0x72   :  { %2538 = vmatprep.subr.bf16.mxu0 %v2857_v9  ;;  %v2910_v9 = vld [vmem:[#allocation5 + $0x280] sm:$0xff]  }
  0x73   :  { %2559 = vmatpush3.bf16.msra.mxu1 %v2856_v10  ;;  %v238_v10 = vrot.slane %v2908_v7, %v3221_v36 }
  0x74   :  { %2560 = vmatprep.subr.bf16.mxu1 %v2859_v12  ;;  %v2912_v12 = vld [vmem:[#allocation2 + $0x14] ss:$38 sps:$4 sm:$0xff]  }
  0x75   :  { %2539 = vmatpush3.bf16.msra.mxu0 %v2858_v11  ;;  %v2911_v11 = vld [vmem:[#allocation5 + $0x378] sm:$0xff]  }
  0x76   :  { %2540 = vmatprep.subr.bf16.mxu0 %v2861_v13  ;;  %v2913_v13 = vld [vmem:[#allocation2 + $0x60] ss:$38 sps:$4 sm:$0xff]  }
  0x77   :  { %2561 = vmatpush3.bf16.msra.mxu1 %v2860_v14  ;;  %v247_v14 = vcombine.high %v224_v8, %v238_v10 }
  0x78   :  { %2562 = vmatprep.subr.bf16.mxu1 %v2863_v16  ;;  %v231_v16 = vrot.slane %v2912_v12, %v3221_v36  ;;  %v2954_v12 = vld [vmem:[#allocation5 + $0x430] sm:$0xff]  }
  0x79   :  { %2541 = vmatpush3.bf16.msra.mxu0 %v2862_v15  ;;  %v246_v15 = vcombine.low %v224_v8, %v238_v10  ;;  %v2953_v8 = vld [vmem:[#allocation5 + $0x470] sm:$0xff]  }
  0x7a   :  { %2542 = vmatprep.subr.bf16.mxu0 %v2865_v18  ;;  %v2915_v18 = vld [vmem:[#allocation5 + $0x3f8] sm:$0xff]  }
  0x7b   :  { %2563 = vmatpush3.bf16.msra.mxu1 %v2864_v17  ;;  %v245_v17 = vrot.slane %v2913_v13, %v3221_v36  ;;  %v348_v21 = vpack.c.bf16 %v246_v15, %v246_v15  ;;  %v2955_v13 = vld [vmem:[#allocation5 + $0x468] sm:$0xff]   ;;  %v2957_v15 = vld [vmem:[#allocation5 + $0x460] sm:$0xff]  }
  0x7c   :  { %2564 = vmatprep.subr.bf16.mxu1 %v2867_v20  ;;  %v349_v20 = vpack.c.bf16 %v247_v14, %v247_v14  ;;  %v2956_v14 = vld [vmem:[#allocation5 + $0x428] sm:$0xff]  }
  0x7d   :  { %2543 = vmatpush3.bf16.msra.mxu0 %v2866_v19  ;;  %v2914_v19 = vld [vmem:[#allocation5 + $0x338] sm:$0xff]   ;;  %v249_v22 = vcombine.high %v231_v16, %v245_v17 }
  0x7e   :  { %2572 = vmatprep.subr.bf16.mxu0 %v2873_v26 }
  0x7f   :  { %2565 = vmatpush3.bf16.msra.mxu1 %v2872_v23  ;;  %v248_v23 = vcombine.low %v231_v16, %v245_v17  ;;  %v351_v26 = vpack.c.bf16 %v249_v22, %v249_v22  ;;  %v2963_v16 = vld [vmem:[#allocation5 + $0x490] sm:$0xff]   ;;  %v2958_v17 = vld [vmem:[#allocation5 + $0x420] sm:$0xff]  }
  0x80   :  { %2594 = vmatprep.subr.bf16.mxu1 %v2877_v33  ;;  %1659 = vmatmul.mubr.bf16.vlgmr.msra.gmra.mxu0 %v344_v35  ;;  %v2923_v33 = vld [vmem:[#allocation5 + $0x3e8] sm:$0xff]   ;;  %v2925_v35 = vld [vmem:[#allocation5 + $0x360] sm:$0xff]   ;;  %v2961_v22 = vld [vmem:[#allocation5 + $0x450] sm:$0xff]  }
  0x81   :  { %2573 = vmatpush3.bf16.msra.mxu0 %v2876_v37  ;;  %1738 = vmatprep.mubr.bf16.mxu0 %v349_v20  ;;  %v350_v27 = vpack.c.bf16 %v248_v23, %v248_v23  ;;  %v2926_v37 = vld [vmem:[#allocation5 + $0x320] sm:$0xff]   ;;  %v2960_v20 = vld [vmem:[#allocation5 + $0x418] sm:$0xff]   ;;  %v2970_v23 = vld [vmem:[#allocation2 + $0x20] ss:$38 sps:$4 sm:$0xff]  }
  0x82   :  { %2574 = vmatprep.subr.bf16.mxu0 %v2879_v40  ;;  %1699 = vmatmul.mubr.bf16.vlgmr.msra.gmra.mxu1 %v346_v43  ;;  %v2929_v40 = vld [vmem:[#allocation5 + $0x358] sm:$0xff]  }
  0x83   :  { %2595 = vmatpush3.bf16.msra.mxu1 %v2878_v41  ;;  %1778 = vmatprep.mubr.bf16.mxu1 %v351_v26  ;;  %v2930_v41 = vld [vmem:[#allocation5 + $0x318] sm:$0xff]  }
  0x84   :  { %2596 = vmatprep.subr.bf16.mxu1 %v2881_v45  ;;  %v2932_v43 = vld [vmem:[#allocation5 + $0x398] sm:$0xff]   ;;  %v2934_v45 = vld [vmem:[#allocation5 + $0x310] sm:$0xff]  }
  0x85   :  { %2575 = vmatpush3.bf16.msra.mxu0 %v2880_v44  ;;  %v2933_v44 = vld [vmem:[#allocation5 + $0x350] sm:$0xff]  }
  0x86   :  { %2576 = vmatprep.subr.bf16.mxu0 %v2883_v46  ;;  %v2935_v46 = vld [vmem:[#allocation5 + $0x3d0] sm:$0xff]  }
  0x87   :  { %2597 = vmatpush3.bf16.msra.mxu1 %v2882_v47  ;;  %v2936_v47 = vld [vmem:[#allocation5 + $0x390] sm:$0xff]  }
  0x88   :  { %2598 = vmatprep.subr.bf16.mxu1 %v2885_v49  ;;  %v2938_v49 = vld [vmem:[#allocation5 + $0x308] sm:$0xff]   ;;  %v2973_v26 = vld [vmem:[#allocation2 + $0x6c] ss:$38 sps:$4 sm:$0xff]  }
  0x89   :  { %2577 = vmatpush3.bf16.msra.mxu0 %v2884_v48  ;;  %v2937_v48 = vld [vmem:[#allocation5 + $0x348] sm:$0xff]  }
  0x8a   :  { %2578 = vmatprep.subr.bf16.mxu0 %v2887_v50  ;;  %v2939_v50 = vld [vmem:[#allocation5 + $0x3c8] sm:$0xff]  }
  0x8b   :  { %2599 = vmatpush3.bf16.msra.mxu1 %v2886_v51  ;;  %v2940_v51 = vld [vmem:[#allocation5 + $0x388] sm:$0xff]  }
  0x8c   :  { %2600 = vmatprep.subr.bf16.mxu1 %v2889_v53  ;;  %v2942_v53 = vld [vmem:[#allocation5 + $0x300] sm:$0xff]  }
  0x8d   :  { %2579 = vmatpush3.bf16.msra.mxu0 %v2888_v52  ;;  %v2941_v52 = vld [vmem:[#allocation5 + $0x340] sm:$0xff]  }
  0x8e   :  { %2580 = vmatprep.subr.bf16.mxu0 %v2891_v54  ;;  %v2943_v54 = vld [vmem:[#allocation5 + $0x3c0] sm:$0xff]  }
  0x8f   :  { %2601 = vmatpush3.bf16.msra.mxu1 %v2890_v55  ;;  %v2944_v55 = vld [vmem:[#allocation2 + $0x18] ss:$38 sps:$4 sm:$0xff]  }
  0x90   :  { %2602 = vmatprep.subr.bf16.mxu1 %v2893_v57  ;;  %v2948_v57 = vld [vmem:[#allocation5 + $0x380] sm:$0xff]  }
  0x91   :  { %2581 = vmatpush3.bf16.msra.mxu0 %v2892_v56  ;;  %v2946_v56 = vld [vmem:[#allocation2 + $0x64] ss:$38 sps:$4 sm:$0xff]  }
  0x92   :  { %2582 = vmatprep.subr.bf16.mxu0 %v2895_v58  ;;  %v260_v58 = vrot.slane %v2944_v55, %v3221_v36 }
  0x93   :  { %2603 = vmatpush3.bf16.msra.mxu1 %v2894_v59  ;;  %v274_v59 = vrot.slane %v2946_v56, %v3221_v36 }
  0x94   :  { %2604 = vmatprep.subr.bf16.mxu1 %v2897_v61  ;;  %v2950_v61 = vld [vmem:[#allocation2 + $0x1c] ss:$38 sps:$4 sm:$0xff]  }
  0x95   :  { %2583 = vmatpush3.bf16.msra.mxu0 %v2896_v60  ;;  %v2949_v60 = vld [vmem:[#allocation5 + $0x478] sm:$0xff]  }
  0x96   :  { %2584 = vmatprep.subr.bf16.mxu0 %v2899_v62  ;;  %v2951_v62 = vld [vmem:[#allocation2 + $0x68] ss:$38 sps:$4 sm:$0xff]  }
  0x97   :  { %2605 = vmatpush3.bf16.msra.mxu1 %v2898_v63  ;;  %v283_v63 = vcombine.high %v260_v58, %v274_v59 }
  0x98   :  { %2606 = vmatprep.subr.bf16.mxu1 %v2901_v1  ;;  %v267_v1 = vrot.slane %v2950_v61, %v3221_v36  ;;  %v2982_v61 = vld [vmem:[#allocation7 + $0x8] sm:$0xff]  }
  0x99   :  { %2585 = vmatpush3.bf16.msra.mxu0 %v2900_v0  ;;  %v282_v0 = vcombine.low %v260_v58, %v274_v59 }
  0x9a   :  { %2586 = vmatprep.subr.bf16.mxu0 %v2903_v3  ;;  %v353_v3 = vpack.c.bf16 %v283_v63, %v283_v63  ;;  %v2984_v63 = vld [vmem:[#allocation8 + $0x38] sm:$0xff]  }
  0x9b   :  { %2607 = vmatpush3.bf16.msra.mxu1 %v2902_v2  ;;  %v281_v2 = vrot.slane %v2951_v62, %v3221_v36  ;;  %v2983_v62 = vld [vmem:[#allocation7] sm:$0xff]  }
  0x9c   :  { %2608 = vmatprep.subr.bf16.mxu1 %v2905_v5  ;;  %v2952_v5 = vld [vmem:[#allocation5 + $0x438] sm:$0xff]  }
  0x9d   :  { %2587 = vmatpush3.bf16.msra.mxu0 %v2904_v4  ;;  %v352_v4 = vpack.c.bf16 %v282_v0, %v282_v0  ;;  %v285_v6 = vcombine.high %v267_v1, %v281_v2  ;;  %v284_v7 = vcombine.low %v267_v1, %v281_v2  ;;  %v2985_v0 = vld [vmem:[#allocation8 + $0x30] sm:$0xff]   ;;  %v2986_v1 = vld [vmem:[#allocation8 + $0x28] sm:$0xff]   ;;  %v2987_v2 = vld [vmem:[#allocation8 + $0x20] sm:$0xff]  }
  0x9e   :  { %2616 = vmatprep.subr.bf16.mxu0 %v2911_v11 }
  0x9f   :  { %2609 = vmatpush3.bf16.msra.mxu1 %v2910_v9  ;;  %v3138_v9 = vmov 0.0   ;;  %v355_v10 = vpack.c.bf16 %v285_v6, %v285_v6  ;;  %v354_v11 = vpack.c.bf16 %v284_v7, %v284_v7 }
  0xa0   :  { %2638 = vmatprep.subr.bf16.mxu1 %v2915_v18  ;;  %1739 = vmatmul.mubr.bf16.vlgmr.msra.gmra.mxu0 %v348_v21  ;;  %v2966_v18 = vld [vmem:[#allocation5 + $0x488] sm:$0xff]   ;;  %v2969_v21 = vld [vmem:[#allocation5 + $0x480] sm:$0xff]  }
  0xa1   :  { %2617 = vmatpush3.bf16.msra.mxu0 %v2914_v19  ;;  %1818 = vmatprep.mubr.bf16.mxu0 %v353_v3  ;;  %v2959_v19 = vld [vmem:[#allocation5 + $0x458] sm:$0xff]  }
  0xa2   :  { %1779 = vmatmul.mubr.bf16.vlgmr.msra.gmra.mxu1 %v350_v27  ;;  %2618 = vmatprep.subr.bf16.mxu0 %v2917_v25  ;;  %v2962_v25 = vld [vmem:[#allocation5 + $0x410] sm:$0xff]   ;;  %v2975_v27 = vld [vmem:[#allocation2 + $0x70] ss:$38 sps:$4 sm:$0x33]  }
  0xa3   :  { %2639 = vmatpush3.bf16.msra.mxu1 %v2916_v24  ;;  %1858 = vmatprep.mubr.bf16.mxu1 %v355_v10  ;;  %v2972_v24 = vld [vmem:[#allocation2 + $0x24] ss:$38 sps:$4 sm:$0x33]  }
  0xa4   :  { %2640 = vmatprep.subr.bf16.mxu1 %v2919_v29  ;;  %v296_v29 = vrot.slane %v2970_v23, %v3221_v36  ;;  %v2989_v10 = vld [vmem:[#allocation8 + $0x10] sm:$0xff]  }
  0xa5   :  { %2619 = vmatpush3.bf16.msra.mxu0 %v2918_v28  ;;  %v2964_v28 = vld [vmem:[#allocation5 + $0x448] sm:$0xff]  }
  0xa6   :  { %2620 = vmatprep.subr.bf16.mxu0 %v2921_v31  ;;  %v310_v31 = vrot.slane %v2973_v26, %v3221_v36 }
  0xa7   :  { %2641 = vmatpush3.bf16.msra.mxu1 %v2920_v30  ;;  %v303_v30 = vrot.slane %v2972_v24, %v3221_v36 }
  0xa8   :  { %2642 = vmatprep.subr.bf16.mxu1 %v2923_v33  ;;  %v2965_v33 = vld [vmem:[#allocation5 + $0x408] sm:$0xff]  }
  0xa9   :  { %2621 = vmatpush3.bf16.msra.mxu0 %v2922_v32  ;;  %v317_v32 = vrot.slane %v2975_v27, %v3221_v36 }
  0xaa   :  { %2622 = vmatprep.subr.bf16.mxu0 %v2925_v35 }
  0xab   :  { %2643 = vmatpush3.bf16.msra.mxu1 %v2924_v34  ;;  %v319_v34 = vcombine.high %v296_v29, %v310_v31  ;;  %v320_v35 = vcombine.low %v303_v30, %v317_v32 }
  0xac   :  { %2644 = vmatprep.subr.bf16.mxu1 %v2927_v38 }
  0xad   :  { %2623 = vmatpush3.bf16.msra.mxu0 %v2926_v37  ;;  %v2967_v37 = vld [vmem:[#allocation5 + $0x440] sm:$0xff]   ;;  %v357_v38 = vpack.c.bf16 %v319_v34, %v319_v34 }
  0xae   :  { %2624 = vmatprep.subr.bf16.mxu0 %v2929_v40  ;;  %v2968_v40 = vld [vmem:[#allocation5 + $0x400] sm:$0xff]  }
  0xaf   :  { %2645 = vmatpush3.bf16.msra.mxu1 %v2928_v39  ;;  %v358_v39 = vpack.c.bf16 %v320_v35, %v320_v35 }
  0xb0   :  { %2646 = vmatprep.subr.bf16.mxu1 %v2931_v42  ;;  %v2976_v42 = vld [vmem:[#allocation7 + $0x38] sm:$0xff]  }
  0xb1   :  { %2625 = vmatpush3.bf16.msra.mxu0 %v2930_v41  ;;  %v318_v41 = vcombine.low %v296_v29, %v310_v31 }
  0xb2   :  { %2626 = vmatprep.subr.bf16.mxu0 %v2933_v44  ;;  %v2978_v44 = vld [vmem:[#allocation7 + $0x28] sm:$0xff]  }
  0xb3   :  { %2647 = vmatpush3.bf16.msra.mxu1 %v2932_v43  ;;  %v356_v36 = vpack.c.bf16 %v318_v41, %v318_v41  ;;  %v2977_v43 = vld [vmem:[#allocation7 + $0x30] sm:$0xff]  }
  0xb4   :  { %2648 = vmatprep.subr.bf16.mxu1 %v2935_v46  ;;  %v2980_v46 = vld [vmem:[#allocation7 + $0x18] sm:$0xff]  }
  0xb5   :  { %2627 = vmatpush3.bf16.msra.mxu0 %v2934_v45  ;;  %v2979_v45 = vld [vmem:[#allocation7 + $0x20] sm:$0xff]  }
  0xb6   :  { %2628 = vmatprep.subr.bf16.mxu0 %v2937_v48  ;;  %v2308_v48 = vld [vmem:[%s3296_s2] ss:$0 sm:$0xff] }
  0xb7   :  { %2649 = vmatpush3.bf16.msra.mxu1 %v2936_v47 }
  0xb8   :  { %2650 = vmatprep.subr.bf16.mxu1 %v2939_v50 }
  0xb9   :  { %2629 = vmatpush3.bf16.msra.mxu0 %v2938_v49 }
  0xba   :  { %2630 = vmatprep.subr.bf16.mxu0 %v2941_v52 }
  0xbb   :  { %2651 = vmatpush3.bf16.msra.mxu1 %v2940_v51 }
  0xbc   :  { %2652 = vmatprep.subr.bf16.mxu1 %v2943_v54 }
  0xbd   :  { %2631 = vmatpush3.bf16.msra.mxu0 %v2942_v53 }
  0xbe   :  { %2660 = vmatprep.subr.bf16.mxu0 %v2949_v60  ;;  %v2981_v60 = vld [vmem:[#allocation7 + $0x10] sm:$0xff]  }
  0xbf   :  { %2653 = vmatpush3.bf16.msra.mxu1 %v2948_v57 }
  0xc0   :  { %2713 = vmatprep.subr.bf16.mxu1 %v3138_v9  ;;  %1819 = vmatmul.mubr.bf16.vlgmr.msra.gmra.mxu0 %v352_v4  ;;  %v2988_v4 = vld [vmem:[#allocation8 + $0x18] sm:$0xff]  }
  0xc1   :  { %2661 = vmatpush3.bf16.msra.mxu0 %v2952_v5  ;;  %1898 = vmatprep.mubr.bf16.mxu0 %v357_v38 }
  0xc2   :  { %2662 = vmatprep.subr.bf16.mxu0 %v2953_v8  ;;  %1859 = vmatmul.mubr.bf16.vlgmr.msra.gmra.mxu1 %v354_v11 }
  0xc3   :  { %2719 = vmatprep.mubr.msk.bf16.mxu1 %vm3139_vm0, %v3138_v9  ;;  %2714 = vmatpush3.bf16.msra.mxu1 %v2963_v16 }
  0xc4   :  { %2715 = vmatprep.subr.bf16.mxu1 %v3138_v9 }
  0xc5   :  { %2663 = vmatpush3.bf16.msra.mxu0 %v2954_v12 }
  0xc6   :  { %2664 = vmatprep.subr.bf16.mxu0 %v2955_v13 }
  0xc7   :  { %2716 = vmatpush3.bf16.msra.mxu1 %v2966_v18 }
  0xc8   :  { %2717 = vmatprep.subr.bf16.mxu1 %v3138_v9 }
  0xc9   :  { %2665 = vmatpush3.bf16.msra.mxu0 %v2956_v14 }
  0xca   :  { %2666 = vmatprep.subr.bf16.mxu0 %v2957_v15 }
  0xcb   :  { %2718 = vmatpush3.bf16.msra.mxu1 %v2969_v21 }
  0xcc   :  { %2723 = vmatprep.subr.bf16.mxu1 %v3138_v9 }
  0xcd   :  { %2667 = vmatpush3.bf16.msra.mxu0 %v2958_v17 }
  0xce   :  { %2668 = vmatprep.subr.bf16.mxu0 %v2959_v19  ;;  %2720 = vmatmul.mubr.msk.bf16.vlgmr.msra.gmra.mxu1 %vm1542_vm1, %v358_v39 }
  0xcf   :  { %2739 = vmatprep.mubr.msk.bf16.mxu1 %vm3139_vm0, %v3138_v9  ;;  %2724 = vmatpush3.bf16.msra.mxu1 %v2976_v42 }
  0xd0   :  { %2725 = vmatprep.subr.bf16.mxu1 %v3138_v9 }
  0xd1   :  { %2669 = vmatpush3.bf16.msra.mxu0 %v2960_v20 }
  0xd2   :  { %2670 = vmatprep.subr.bf16.mxu0 %v2961_v22 }
  0xd3   :  { %2726 = vmatpush3.bf16.msra.mxu1 %v2977_v43 }
  0xd4   :  { %2727 = vmatprep.subr.bf16.mxu1 %v3138_v9 }
  0xd5   :  { %2671 = vmatpush3.bf16.msra.mxu0 %v2962_v25 }
  0xd6   :  { %2672 = vmatprep.subr.bf16.mxu0 %v2964_v28 }
  0xd7   :  { %2728 = vmatpush3.bf16.msra.mxu1 %v2978_v44 }
  0xd8   :  { %2729 = vmatprep.subr.bf16.mxu1 %v3138_v9 }
  0xd9   :  { %2673 = vmatpush3.bf16.msra.mxu0 %v2965_v33 }
  0xda   :  { %2674 = vmatprep.subr.bf16.mxu0 %v2967_v37 }
  0xdb   :  { %2730 = vmatpush3.bf16.msra.mxu1 %v2979_v45 }
  0xdc   :  { %2731 = vmatprep.subr.bf16.mxu1 %v3138_v9 }
  0xdd   :  { %2675 = vmatpush3.bf16.msra.mxu0 %v2968_v40 }
  0xde   :  { %2743 = vmatprep.subr.bf16.mxu0 %v3138_v9 }
  0xdf   :  { %2732 = vmatpush3.bf16.msra.mxu1 %v2980_v46 }
  0xe0   :  { %1899 = vmatmul.mubr.bf16.vlgmr.msra.gmra.mxu0 %v356_v36  ;;  %2733 = vmatprep.subr.bf16.mxu1 %v3138_v9 }
  0xe1   :  { %2759 = vmatprep.mubr.msk.bf16.mxu0 %vm3139_vm0, %v3138_v9  ;;  %2744 = vmatpush3.bf16.msra.mxu0 %v2984_v63  ;;  %v2457_v63 = vld [vmem:[%s3298_s4] ss:$0 sm:$0xff]  ;;  %s3140_s4 = smov 112  }
  0xe2   :  { %2745 = vmatprep.subr.bf16.mxu0 %v3138_v9 }
  0xe3   :  { %2734 = vmatpush3.bf16.msra.mxu1 %v2981_v60  ;;  %v2995_v60 = vld [vmem:[#allocation10 + $0x20] sm:$0xff]  }
  0xe4   :  { %2735 = vmatprep.subr.bf16.mxu1 %v3138_v9 }
  0xe5   :  { %2746 = vmatpush3.bf16.msra.mxu0 %v2985_v0 }
  0xe6   :  { %2747 = vmatprep.subr.bf16.mxu0 %v3138_v9 }
  0xe7   :  { %2736 = vmatpush3.bf16.msra.mxu1 %v2982_v61  ;;  %v2996_v61 = vld [vmem:[#allocation10 + $0x18] sm:$0xff]  }
  0xe8   :  { %2737 = vmatprep.subr.bf16.mxu1 %v3138_v9 }
  0xe9   :  { %2748 = vmatpush3.bf16.msra.mxu0 %v2986_v1 }
  0xea   :  { %2749 = vmatprep.subr.bf16.mxu0 %v3138_v9 }
  0xeb   :  { %2738 = vmatpush3.bf16.msra.mxu1 %v2983_v62  ;;  %v2997_v62 = vld [vmem:[#allocation10 + $0x10] sm:$0xff]  }
  0xec   :  { %2763 = vmatprep.subr.bf16.mxu1 %v3138_v9 }
  0xed   :  { %2750 = vmatpush3.bf16.msra.mxu0 %v2987_v2 }
  0xee   :  { %2751 = vmatprep.subr.bf16.mxu0 %v3138_v9 }
  0xf1   :  { %2752 = vmatpush3.bf16.msra.mxu0 %v2988_v4 }
  0xf2   :  { %2753 = vmatprep.subr.bf16.mxu0 %v3138_v9 }
  0xf5   :  { %2754 = vmatpush3.bf16.msra.mxu0 %v2989_v10  ;;  %v2466_v10 = vld [vmem:[%s3300_s6] ss:$0 sm:$0xff] }
  0xf6   :  { %2755 = vmatprep.subr.bf16.mxu0 %v3138_v9 }
 0x120   :  { %v2500_v47 = vpop.f32.mrf.mxu0 }
 0x122   :  { %v2501_v49 = vpop.f32.mrf.mxu0  ;;  %v2522_v51 = vpop.f32.mrf.mxu1 }
 0x123   :  { %v2502_v50 = vadd.f32 %v2501_v49, %v2500_v47 }
 0x124   :  { %v2503_v52 = vpop.f32.mrf.mxu0  ;;  %v2523_v54 = vpop.f32.mrf.mxu1 }
 0x125   :  { %v1581_v53 = vadd.f32 %v2502_v50, %v2308_v48  ;;  %v2524_v55 = vadd.f32 %v2523_v54, %v2522_v51 }
 0x126   :  { %v2504_v56 = vpop.f32.mrf.mxu0  ;;  %v2525_v57 = vpop.f32.mrf.mxu1 }
 0x127   :  { %v1621_v58 = vadd.f32 %v2524_v55, %v1581_v53  ;;  %v2990_v55 = vld [vmem:[#allocation8 + $0x8] sm:$0xff]   ;;  %v2991_v56 = vld [vmem:[#allocation8] sm:$0xff]   ;;  %v2992_v57 = vld [vmem:[#allocation10 + $0x38] sm:$0xff]  }
 0x128   :  { %v2526_v59 = vpop.f32.mrf.mxu1  ;;  %2756 = vmatpush3.bf16.msra.mxu0 %v2990_v55 }
 0x129   :  { %2757 = vmatprep.subr.bf16.mxu0 %v3138_v9  ;;  %v2994_v59 = vld [vmem:[#allocation10 + $0x28] sm:$0xff]  }
 0x12c   :  { %2758 = vmatpush3.bf16.msra.mxu0 %v2991_v56 }
 0x140   :  { %v2544_v3 = vpop.f32.mrf.mxu0 }
 0x142   :  { %v2545_v5 = vpop.f32.mrf.mxu0  ;;  %v2566_v7 = vpop.f32.mrf.mxu1 }
 0x143   :  { %v2546_v6 = vadd.f32 %v2545_v5, %v2544_v3 }
 0x144   :  { %v2547_v8 = vpop.f32.mrf.mxu0  ;;  %v2567_v12 = vpop.f32.mrf.mxu1 }
 0x145   :  { %v1661_v11 = vadd.f32 %v2546_v6, %v1621_v58  ;;  %v2568_v13 = vadd.f32 %v2567_v12, %v2566_v7  ;;  %v2993_v58 = vld [vmem:[#allocation10 + $0x30] sm:$0xff]   ;;  %v2998_v7 = vld [vmem:[#allocation10 + $0x8] sm:$0xff]   ;;  %v2999_v8 = vld [vmem:[#allocation10] sm:$0xff]  }
 0x146   :  { %v2548_v14 = vpop.f32.mrf.mxu0  ;;  %v2569_v15 = vpop.f32.mrf.mxu1 }
 0x147   :  { %v1701_v16 = vadd.f32 %v2568_v13, %v1661_v11 }
 0x148   :  { %v2570_v17 = vpop.f32.mrf.mxu1 }
 0x160   :  { %v2588_v18 = vpop.f32.mrf.mxu0 }
 0x162   :  { %v2589_v19 = vpop.f32.mrf.mxu0  ;;  %v2610_v20 = vpop.f32.mrf.mxu1 }
 0x163   :  { %v2590_v34 = vadd.f32 %v2589_v19, %v2588_v18 }
 0x164   :  { %v2591_v21 = vpop.f32.mrf.mxu0  ;;  %v2611_v22 = vpop.f32.mrf.mxu1 }
 0x165   :  { %v1741_v37 = vadd.f32 %v2590_v34, %v1701_v16  ;;  %v2612_v38 = vadd.f32 %v2611_v22, %v2610_v20 }
 0x166   :  { %v2592_v23 = vpop.f32.mrf.mxu0  ;;  %v2613_v24 = vpop.f32.mrf.mxu1 }
 0x167   :  { %v1781_v36 = vadd.f32 %v2612_v38, %v1741_v37 }
 0x168   :  { %v2614_v25 = vpop.f32.mrf.mxu1 }
 0x180   :  { %v2632_v26 = vpop.f32.mrf.mxu0 }
 0x182   :  { %v2633_v27 = vpop.f32.mrf.mxu0  ;;  %v2654_v28 = vpop.f32.mrf.mxu1 }
 0x183   :  { %v2634_v40 = vadd.f32 %v2633_v27, %v2632_v26 }
 0x184   :  { %v2635_v29 = vpop.f32.mrf.mxu0  ;;  %v2655_v30 = vpop.f32.mrf.mxu1 }
 0x185   :  { %v1821_v43 = vadd.f32 %v2634_v40, %v1781_v36  ;;  %v2656_v44 = vadd.f32 %v2655_v30, %v2654_v28 }
 0x186   :  { %v2636_v31 = vpop.f32.mrf.mxu0  ;;  %v2657_v32 = vpop.f32.mrf.mxu1 }
 0x187   :  { %v1861_v47 = vadd.f32 %v2656_v44, %v1821_v43 }
 0x188   :  { %v2658_v33 = vpop.f32.mrf.mxu1 }
 0x18e   :  { %v1940_v35 = vpop.f32.mrf.mxu1 }
 0x190   :  { %v2721_v39 = vpop.f32.mrf.mxu1 }
 0x192   :  { %v1943_v41 = vpop.f32.mrf.mxu1 }
 0x194   :  { %v2722_v42 = vpop.f32.mrf.mxu1 }
 0x1a0   :  { %v2676_v45 = vpop.f32.mrf.mxu0 }
 0x1a2   :  { %v2677_v46 = vpop.f32.mrf.mxu0 }
 0x1a3   :  { %v2678_v48 = vadd.f32 %v2677_v46, %v2676_v45 }
 0x1a4   :  { %v2679_v49 = vpop.f32.mrf.mxu0 }
 0x1a5   :  { %v1901_v50 = vadd.f32 %v2678_v48, %v1861_v47 }
 0x1a6   :  { %v2680_v51 = vpop.f32.mrf.mxu0 }
 0x1a7   :  { %v1941_v52 = vadd.f32 %v1940_v35, %v1901_v50 }
 0x1a9   :  { %v1946_v53 = vmax.f32 %v1941_v52, 0.0 }
 0x1ab   :  { %v1947_v54 = vpack.c.bf16 %v1946_v53, %v1946_v53 }
 0x1ad   :  { %2740 = vmatmul.mubr.bf16.vlgmr.msra.gmra.mxu1 %v1947_v54 }
 0x1ae   :  { %2779 = vmatprep.mubr.msk.bf16.mxu1 %vm3139_vm0, %v3138_v9  ;;  %2764 = vmatpush3.bf16.msra.mxu1 %v2992_v57 }
 0x1af   :  { %2765 = vmatprep.subr.bf16.mxu1 %v3138_v9 }
 0x1b2   :  { %2766 = vmatpush3.bf16.msra.mxu1 %v2993_v58 }
 0x1b3   :  { %2767 = vmatprep.subr.bf16.mxu1 %v3138_v9 }
 0x1b6   :  { %2768 = vmatpush3.bf16.msra.mxu1 %v2994_v59 }
 0x1b7   :  { %2769 = vmatprep.subr.bf16.mxu1 %v3138_v9 }
 0x1ba   :  { %2770 = vmatpush3.bf16.msra.mxu1 %v2995_v60 }
 0x1bb   :  { %2771 = vmatprep.subr.bf16.mxu1 %v3138_v9 }
 0x1be   :  { %2772 = vmatpush3.bf16.msra.mxu1 %v2996_v61 }
 0x1bf   :  { %2773 = vmatprep.subr.bf16.mxu1 %v3138_v9 }
 0x1c2   :  { %2774 = vmatpush3.bf16.msra.mxu1 %v2997_v62 }
 0x1c3   :  { %2775 = vmatprep.subr.bf16.mxu1 %v3138_v9 }
 0x1c6   :  { %2776 = vmatpush3.bf16.msra.mxu1 %v2998_v7 }
 0x1c7   :  { %2777 = vmatprep.subr.bf16.mxu1 %v3138_v9  ;;  %v2475_v9 = vld [vmem:[%s3302_s8] ss:$0 sm:$0xff] }
 0x1ca   :  { %2778 = vmatpush3.bf16.msra.mxu1 %v2999_v8 }
 0x26d   :  { %v2053_v0 = vpop.f32.mrf.mxu1 }
 0x26e   :  { %v2054_v1 = vadd.f32 %v2457_v63, %v2053_v0 }
 0x26f   :  { %v2741_v2 = vpop.f32.mrf.mxu1 }
 0x270   :  { %v2059_v3 = vmax.f32 %v2054_v1, 0.0 }
 0x271   :  { %v2056_v4 = vpop.f32.mrf.mxu1 }
 0x272   :  { %v2060_v5 = vpack.c.bf16 %v2059_v3, %v2059_v3 }
 0x273   :  { %v2742_v6 = vpop.f32.mrf.mxu1 }
 0x274   :  { %2760 = vmatmul.mubr.bf16.vlgmr.msra.gmra.mxu0 %v2060_v5 }
 0x334   :  { %v2166_v11 = vpop.f32.mrf.mxu0 }
 0x335   :  { %v2167_v12 = vadd.f32 %v2466_v10, %v2166_v11 }
 0x336   :  { %v2761_v13 = vpop.f32.mrf.mxu0 }
 0x337   :  { %v2172_v14 = vmax.f32 %v2167_v12, 0.0 }
 0x338   :  { %v2169_v15 = vpop.f32.mrf.mxu0 }
 0x339   :  { %v2173_v16 = vpack.c.bf16 %v2172_v14, %v2172_v14  ;;  %2285 = vrot.lane.b32.xlu0 %v2172_v14, %s3140_s4 }
 0x33a   :  { %v2762_v17 = vpop.f32.mrf.mxu0 }
 0x33b   :  { %2780 = vmatmul.mubr.bf16.vlgmr.msra.gmra.mxu1 %v2173_v16 }
 0x3ab   :  { %v2286_v20 = vpop.permute.xlu0 %2285 }
 0x3fb   :  { %v2279_v18 = vpop.f32.mrf.mxu1 }
 0x3fc   :  { %v2280_v19 = vadd.f32 %v2475_v9, %v2279_v18 }
 0x3fd   :  { %v2781_v21 = vpop.f32.mrf.mxu1 }
 0x3fe   :  { %v2287_v22 = vadd.f32 %v2286_v20, %v2280_v19 }
 0x3ff   :  { %v2282_v23 = vpop.f32.mrf.mxu1 }
 0x400   :  { %2288 = vst [vmem:[#allocation11] sm:$0xff] %v2287_v22 }
 0x401   :  { %v2782_v24 = vpop.f32.mrf.mxu1 }
 0x402   :  { %2293 = vsyncadd [#allocation4], 96  ;;  %s3141_s6 = smov [#allocation11]  }
 0x403   :  { %s2294_s20 = sshll.u32 %s3141_s6, 4  ;;  %s2295_s20 = int_to_ptr.vmem [resolvable:$true] %s2294_s20 }
 0x404   :  { %s3100_s21 = scalar_lea.vmem %s2295_s20, 32  ;;  %s3104_s22 = scalar_lea.vmem %s2295_s20, 128 }
 0x405   :  { %p3101_p11 = scmp.ne.s32.totalorder %s2295_s20, %s3100_s21  ;;  %p3105_p12 = scmp.lt.s32.totalorder %s2295_s20, %s2295_s20 }
 0x406   :  { %p3106_p13 = scmp.lt.s32.totalorder %s3104_s22, %s3100_s21 }
 0x408   :  { %p3107_p0 = por %p3106_p13, %p3105_p12 }
 0x40a   :  { %p3108_p1 = pnand %p3107_p0, %p3101_p11 }
 0x40c   :  { %3111 = shalt.err (!%p3108_p1)
}
 0x40d   :  { %s3142_s8 = smov 32   ;;  %s3143_s1 = smov 2  }
 0x40e   :  { %2300 = dma.vmem_to_hbm [thread:$0]  %s2295_s20, 32, %s3303_s9, [#allocation4], %s3142_s8, %s3142_s8, %s3143_s1  }
 0x40f   :  { %3126 = dma.done.wait [#allocation4], 128  }
 0x410   :  { %3127 = vsyncadd [#allocation4], 4294967168 }
 0x411   :  { %2304 = vsyncpa [#allocation3], 1 }
 0x412   :  { %2305 = vsyncpa [#allocation6], 1 }
 0x413   :  { %2306 = vsyncpa [#allocation9], 1 }
 0x414   :  { %2307 = vsyncpa [#allocation4], 1 }

</bundles_post_ra>
